<compile_context>
chip_gen: v6e
topology: v6e:2x2x1
jax: 0.10.0
libtpu: 0.0.40
codegen_flags: <defaults>
</compile_context>

<pallas_src>
import jax
import jax.numpy as jnp
from jax import lax
from jax.experimental import pallas as pl
from jax.experimental.pallas import tpu as pltpu

N_HEAD = 6
LN_EPS = 1e-5


def _layer_norm(z, g, b):
    mu = jnp.mean(z, axis=-1, keepdims=True)
    var = jnp.mean(jnp.square(z - mu), axis=-1, keepdims=True)
    return (z - mu) * lax.rsqrt(var + LN_EPS) * g + b


def transformer_block_kernel(x_ref, ln1g_ref, ln1b_ref, wq_ref, wkv_ref,
                             wp3_ref, bp_ref, ln2g_ref, ln2b_ref, w1_ref,
                             b1_ref, w2_ref, b2_ref, o_ref,
                             k_sc, v_sc, m_sc, l_sc, acc_sc):
    _, T, C = x_ref.shape              # x block is the full (1, T, C) sequence
    TQ = o_ref.shape[1]                # query tile rows
    TK = TQ                            # key tile size == query tile size
    nk = T // TK
    H = N_HEAD
    hs = C // H
    cd = wq_ref.dtype                  # MXU input dtype (f32/bf16); acc is f32

    qt = pl.program_id(1)
    ln1g = ln1g_ref[...]               # (1, C)
    ln1b = ln1b_ref[...]

    # ---- LN1 + fused K/V projection over the FULL sequence, once per batch
    # element.  qt is an 'arbitrary' (sequential) grid axis, so the scratch
    # written at qt == 0 stays valid for the remaining query tiles.
    @pl.when(qt == 0)
    def _build_kv():
        @pl.loop(0, nk)
        def _kv(i):
            start = pl.multiple_of(i * TK, TK)
            xs = x_ref[0, pl.ds(start, TK), :]                        # (TK, C)
            h = _layer_norm(xs, ln1g, ln1b)
            kv = jnp.dot(h.astype(cd), wkv_ref[...],
                         preferred_element_type=jnp.float32)          # (TK, 2C)
            k3 = kv[:, :C].reshape(TK, H, hs)
            v3 = kv[:, C:].reshape(TK, H, hs)
            # head-leading (H, TK, hs) layout -> clean batched matmuls later
            k_sc[:, pl.ds(start, TK), :] = (
                jnp.transpose(k3, (1, 0, 2)).astype(k_sc.dtype))
            v_sc[:, pl.ds(start, TK), :] = (
                jnp.transpose(v3, (1, 0, 2)).astype(v_sc.dtype))

    # ---- query tile: LN1 + Q projection (scale folded into Q once) ----------
    q_start = pl.multiple_of(qt * TQ, TQ)
    xq = x_ref[0, pl.ds(q_start, TQ), :]                              # (TQ, C)
    hq = _layer_norm(xq, ln1g, ln1b)
    scale = C ** (-0.5)                # reference scales by n_embd**-0.5
    q2d = jnp.dot(hq.astype(cd), wq_ref[...],
                  preferred_element_type=jnp.float32) * scale         # (TQ, C)
    q3 = jnp.transpose(q2d.reshape(TQ, H, hs), (1, 0, 2)).astype(cd)  # (H,TQ,hs)

    # ---- causal flash-style attention over key tiles 0 .. qt only -----------
    m_sc[...] = jnp.full_like(m_sc, -1e30)      # finite fill: no NaN rows ever
    l_sc[...] = jnp.zeros_like(l_sc)
    acc_sc[...] = jnp.zeros_like(acc_sc)

    row = q_start + lax.broadcasted_iota(jnp.int32, (TQ, TK), 0)

    @pl.loop(0, qt + 1)
    def _att(kt):
        k_start = pl.multiple_of(kt * TK, TK)
        k_t = k_sc[:, pl.ds(k_start, TK), :].astype(cd)               # (H,TK,hs)
        v_t = v_sc[:, pl.ds(k_start, TK), :].astype(cd)
        s = jnp.einsum('hqd,hkd->hqk', q3, k_t,
                       preferred_element_type=jnp.float32)            # (H,TQ,TK)
        col = k_start + lax.broadcasted_iota(jnp.int32, (TQ, TK), 1)
        s = jnp.where((col <= row)[None], s, -1e30)
        m_prev = m_sc[...]
        m_new = jnp.maximum(m_prev, jnp.max(s, axis=-1, keepdims=True))
        alpha = jnp.exp(m_prev - m_new)
        p = jnp.exp(s - m_new)
        l_sc[...] = alpha * l_sc[...] + jnp.sum(p, axis=-1, keepdims=True)
        acc_sc[...] = alpha * acc_sc[...] + jnp.einsum(
            'hqk,hkd->hqd', p.astype(cd), v_t,
            preferred_element_type=jnp.float32)
        m_sc[...] = m_new

    # Deferred, exact softmax normalization (hs multiplies per row, not T).
    att = acc_sc[...] / l_sc[...]                                     # (H,TQ,hs)

    # ---- output projection, head-batched (no (TQ,H,hs)->(TQ,C) relayout) ----
    sa = jnp.sum(
        jnp.einsum('hqd,hdc->hqc', att.astype(cd), wp3_ref[...],
                   preferred_element_type=jnp.float32), axis=0) + bp_ref[...]
    x1 = xq + sa                                     # residual 1 (f32)

    # ---- LayerNorm 2 + feed-forward ----------------------------------------
    h2 = _layer_norm(x1, ln2g_ref[...], ln2b_ref[...])
    hidden = jnp.maximum(
        jnp.dot(h2.astype(cd), w1_ref[...],
                preferred_element_type=jnp.float32) + b1_ref[...], 0.0)  # (TQ,4C)
    ff = jnp.dot(hidden.astype(cd), w2_ref[...],
                 preferred_element_type=jnp.float32) + b2_ref[...]

    o_ref[0] = (x1 + ff).astype(o_ref.dtype)         # residual 2


def transformer_block(x, params, *, tq=None, matmul_dtype=jnp.float32,
                      kv_scratch_dtype=jnp.float32,
                      vmem_limit_bytes=56 * 1024 * 1024):
    B, T, C = x.shape
    H = N_HEAD
    assert C % H == 0, "n_embd must be divisible by n_head"
    hs = C // H
    if tq is None:
        # 256 fills the v6e/v7x MXU M-dim; causal key tiling keeps the live
        # set small enough for this even against v7x's 64 MiB VMEM.
        tq = min(T, 256)
    assert T % tq == 0, "sequence length must be divisible by the query tile"
    nq = T // tq

    ln1g, ln1b, wq, wkv, wp, bp, ln2g, ln2b, w1, b1, w2, b2 = params
    # Head-blocked projection weight (H, hs, C): attention output is contracted
    # per head on the MXU without a (TQ,H,hs)->(TQ,C) relayout in the kernel.
    wp3 = wp.reshape(H, hs, C)
    # Only matmul weights are narrowed; LN params / biases stay f32 (LN,
    # softmax, residuals are f32 elementwise — bf16 elementwise is bad on v5e).
    wq_c, wkv_c, wp3_c, w1_c, w2_c = (w.astype(matmul_dtype)
                                      for w in (wq, wkv, wp3, w1, w2))
    weight_args = (ln1g, ln1b, wq_c, wkv_c, wp3_c, bp, ln2g, ln2b,
                   w1_c, b1, w2_c, b2)

    def weight_spec(a):
        # Constant block index across the whole grid -> DMA'd once; single
        # buffering halves resident weight VMEM (matters on v7x's 64 MiB).
        return pl.BlockSpec(a.shape, lambda b, qt, _nd=a.ndim: (0,) * _nd,
                            pipeline_mode=pl.Buffered(1))

    in_specs = [
        # Full sequence; block index is constant along qt, so it is fetched
        # once per batch element. Query rows are sliced from it in-kernel.
        pl.BlockSpec((1, T, C), lambda b, qt: (b, 0, 0)),
    ] + [weight_spec(a) for a in weight_args]

    w_bytes = sum(int(w.size) * w.dtype.itemsize for w in weight_args)
    cost = pl.CostEstimate(
        flops=int(24 * B * T * C * C + 2 * B * T * T * C),
        transcendentals=int(B * H * T * T // 2),
        bytes_accessed=int(2 * B * T * C * 4 + w_bytes))

    return pl.pallas_call(
        transformer_block_kernel,
        out_shape=jax.ShapeDtypeStruct((B, T, C), x.dtype),
        grid=(B, nq),
        in_specs=in_specs,
        out_specs=pl.BlockSpec((1, tq, C), lambda b, qt: (b, qt, 0)),
        scratch_shapes=[
            pltpu.VMEM((H, T, hs), kv_scratch_dtype),   # K (head-leading)
            pltpu.VMEM((H, T, hs), kv_scratch_dtype),   # V (head-leading)
            pltpu.VMEM((H, tq, 1), jnp.float32),        # online-softmax m
            pltpu.VMEM((H, tq, 1), jnp.float32),        # online-softmax l
            pltpu.VMEM((H, tq, hs), jnp.float32),       # attention accumulator
        ],
        compiler_params=pltpu.CompilerParams(
            # B "parallel" (shards across v7x's 2 TensorCores); qt "arbitrary"
            # so the per-batch K/V scratch written at qt==0 is reused safely.
            dimension_semantics=("parallel", "arbitrary"),
            vmem_limit_bytes=vmem_limit_bytes),
        cost_estimate=cost,
    )(x, *weight_args)


def init_params(key, C):
    keys = jax.random.split(key, 7)
    s = 0.02
    ln1g = jnp.ones((1, C), jnp.float32)
    ln1b = jnp.zeros((1, C), jnp.float32)
    wq = jax.random.normal(keys[0], (C, C), jnp.float32) * s        # Q (no bias)
    wkv = jax.random.normal(keys[1], (C, 2 * C), jnp.float32) * s   # fused K|V (no bias)
    wp = jax.random.normal(keys[2], (C, C), jnp.float32) * s        # proj weight
    bp = jax.random.normal(keys[3], (1, C), jnp.float32) * s        # proj bias
    ln2g = jnp.ones((1, C), jnp.float32)
    ln2b = jnp.zeros((1, C), jnp.float32)
    w1 = jax.random.normal(keys[4], (C, 4 * C), jnp.float32) * s    # FFN in
    b1 = jax.random.normal(keys[5], (1, 4 * C), jnp.float32) * s
    w2 = jax.random.normal(keys[6], (4 * C, C), jnp.float32) * s    # FFN out
    b2 = jnp.zeros((1, C), jnp.float32)
    return (ln1g, ln1b, wq, wkv, wp, bp, ln2g, ln2b, w1, b1, w2, b2)


def reference(x, params):
    """Pure-JAX reference mirroring the PyTorch forward (dropout = identity)."""
    ln1g, ln1b, wq, wkv, wp, bp, ln2g, ln2b, w1, b1, w2, b2 = params
    B, T, C = x.shape
    H, hs = N_HEAD, C // N_HEAD

    def ln(z, g, b):
        mu = z.mean(-1, keepdims=True)
        var = ((z - mu) ** 2).mean(-1, keepdims=True)
        return (z - mu) / jnp.sqrt(var + LN_EPS) * g + b

    h = ln(x, ln1g[0], ln1b[0])
    q = (h @ wq).reshape(B, T, H, hs)
    kv = h @ wkv
    k = kv[..., :C].reshape(B, T, H, hs)
    v = kv[..., C:].reshape(B, T, H, hs)
    wei = jnp.einsum('bqhd,bkhd->bhqk', q, k) * C ** (-0.5)
    mask = jnp.tril(jnp.ones((T, T), bool))
    wei = jnp.where(mask[None, None], wei, -jnp.inf)
    p = jax.nn.softmax(wei, axis=-1)
    att = jnp.einsum('bhqk,bkhd->bqhd', p, v).reshape(B, T, C)
    x1 = x + att @ wp + bp[0]
    h2 = ln(x1, ln2g[0], ln2b[0])
    ff = jnp.maximum(h2 @ w1 + b1[0], 0.0) @ w2 + b2[0]
    return x1 + ff


if __name__ == "__main__":
    # Small shapes consistent with the module: n_head=6 -> pick n_embd=48 (hs=8).
    # T=16 with tq=8 exercises 2-way query tiling, the qt==0 K/V scratch build,
    # and the causal key-tile loop (grid = (B, 2)).
    B, T, C = 2, 16, 48
    key = jax.random.PRNGKey(0)
    kx, kp = jax.random.split(key)
    x = jax.random.normal(kx, (B, T, C), jnp.float32)
    params = init_params(kp, C)

    ref = reference(x, params)

    # f32 matmul path (exact deferred-normalization divide -> tight tolerance).
    out = transformer_block(x, params, tq=8, matmul_dtype=jnp.float32)
    out = jax.block_until_ready(out)
    assert out.shape == (B, T, C)
    assert jnp.allclose(out, ref, atol=2e-3, rtol=2e-3), "f32 mismatch vs reference"

    # bf16-input / f32-accumulate matmul path (v5e/v6e/v7x production setting).
    out_bf16 = transformer_block(x, params, tq=8, matmul_dtype=jnp.bfloat16)
    out_bf16 = jax.block_until_ready(out_bf16)
    assert jnp.allclose(out_bf16, ref, atol=5e-2, rtol=5e-2), "bf16 mismatch vs reference"

    print("KERNEL_OK")
</pallas_src>

<mosaic_0001>
module attributes {stable_mosaic.version = 11 : i64} {
  func.func @transformer_block_kernel(%arg0: i32, %arg1: i32, %arg2: memref<1x16x48xf32, #tpu.memory_space<vmem>>, %arg3: memref<1x48xf32, #tpu.memory_space<vmem>>, %arg4: memref<1x48xf32, #tpu.memory_space<vmem>>, %arg5: memref<48x48xf32, #tpu.memory_space<vmem>>, %arg6: memref<48x96xf32, #tpu.memory_space<vmem>>, %arg7: memref<6x8x48xf32, #tpu.memory_space<vmem>>, %arg8: memref<1x48xf32, #tpu.memory_space<vmem>>, %arg9: memref<1x48xf32, #tpu.memory_space<vmem>>, %arg10: memref<1x48xf32, #tpu.memory_space<vmem>>, %arg11: memref<48x192xf32, #tpu.memory_space<vmem>>, %arg12: memref<1x192xf32, #tpu.memory_space<vmem>>, %arg13: memref<192x48xf32, #tpu.memory_space<vmem>>, %arg14: memref<1x48xf32, #tpu.memory_space<vmem>>, %arg15: memref<1x8x48xf32, #tpu.memory_space<vmem>>, %arg16: memref<6x16x8xf32, #tpu.memory_space<vmem>>, %arg17: memref<6x16x8xf32, #tpu.memory_space<vmem>>, %arg18: memref<6x8x1xf32, #tpu.memory_space<vmem>>, %arg19: memref<6x8x1xf32, #tpu.memory_space<vmem>>, %arg20: memref<6x8x8xf32, #tpu.memory_space<vmem>>) attributes {dimension_semantics = [#tpu.dimension_semantics<parallel>, #tpu.dimension_semantics<arbitrary>], iteration_bounds = array<i64: 2, 2>, scalar_prefetch = 0 : i64, scratch_operands = 5 : i64, tpu.core_type = #tpu.core_type<tc>, window_params = [{transform_indices = @transform_0, window_bounds = array<i64: 1, 16, 48>}, {pipeline_mode = #tpu.pipeline_mode<synchronous>, transform_indices = @transform_1, window_bounds = array<i64: 1, 48>}, {pipeline_mode = #tpu.pipeline_mode<synchronous>, transform_indices = @transform_2, window_bounds = array<i64: 1, 48>}, {pipeline_mode = #tpu.pipeline_mode<synchronous>, transform_indices = @transform_3, window_bounds = array<i64: 48, 48>}, {pipeline_mode = #tpu.pipeline_mode<synchronous>, transform_indices = @transform_4, window_bounds = array<i64: 48, 96>}, {pipeline_mode = #tpu.pipeline_mode<synchronous>, transform_indices = @transform_5, window_bounds = array<i64: 6, 8, 48>}, {pipeline_mode = #tpu.pipeline_mode<synchronous>, transform_indices = @transform_6, window_bounds = array<i64: 1, 48>}, {pipeline_mode = #tpu.pipeline_mode<synchronous>, transform_indices = @transform_7, window_bounds = array<i64: 1, 48>}, {pipeline_mode = #tpu.pipeline_mode<synchronous>, transform_indices = @transform_8, window_bounds = array<i64: 1, 48>}, {pipeline_mode = #tpu.pipeline_mode<synchronous>, transform_indices = @transform_9, window_bounds = array<i64: 48, 192>}, {pipeline_mode = #tpu.pipeline_mode<synchronous>, transform_indices = @transform_10, window_bounds = array<i64: 1, 192>}, {pipeline_mode = #tpu.pipeline_mode<synchronous>, transform_indices = @transform_11, window_bounds = array<i64: 192, 48>}, {pipeline_mode = #tpu.pipeline_mode<synchronous>, transform_indices = @transform_12, window_bounds = array<i64: 1, 48>}, {transform_indices = @transform_13, window_bounds = array<i64: 1, 8, 48>}]} {
    %c0 = arith.constant 0 : index
    %c0_0 = arith.constant 0 : index
    %0 = vector.load %arg3[%c0, %c0_0] : memref<1x48xf32, #tpu.memory_space<vmem>>, vector<1x48xf32>
    %c0_1 = arith.constant 0 : index
    %c0_2 = arith.constant 0 : index
    %1 = vector.load %arg4[%c0_1, %c0_2] : memref<1x48xf32, #tpu.memory_space<vmem>>, vector<1x48xf32>
    %c0_i32 = arith.constant 0 : i32
    %2 = arith.cmpi eq, %arg1, %c0_i32 : i32
    %3 = arith.extui %2 : i1 to i32
    %c0_i32_3 = arith.constant 0 : i32
    %4 = arith.cmpi ne, %3, %c0_i32_3 : i32
    scf.if %4 {
      %c0_i32_70 = arith.constant 0 : i32
      %c2_i32 = arith.constant 2 : i32
      %105 = arith.addi %c0_i32_70, %c2_i32 : i32
      %c1_i32_71 = arith.constant 1 : i32
      scf.for %arg21 = %c0_i32_70 to %105 step %c1_i32_71  : i32 {
        %c1_i32_73 = arith.constant 1 : i32
        %106 = arith.muli %arg21, %c1_i32_73 : i32
        %c0_i32_74 = arith.constant 0 : i32
        %107 = arith.addi %c0_i32_74, %106 : i32
        %c8_i32_75 = arith.constant 8 : i32
        %108 = arith.muli %107, %c8_i32_75 : i32
        %109 = tpu.assume_multiple %108, 8 : i32
        %c0_76 = arith.constant 0 : index
        %110 = arith.index_cast %109 : i32 to index
        %c0_77 = arith.constant 0 : index
        %111 = vector.load %arg2[%c0_76, %110, %c0_77] : memref<1x16x48xf32, #tpu.memory_space<vmem>>, vector<1x8x48xf32>
        %112 = vector.shape_cast %111 : vector<1x8x48xf32> to vector<8x48xf32>
        %cst_78 = arith.constant dense<0.000000e+00> : vector<8xf32>
        %113 = vector.multi_reduction <add>, %112, %cst_78 [1] : vector<8x48xf32> to vector<8xf32>
        %114 = vector.shape_cast %113 : vector<8xf32> to vector<8x1xf32>
        %cst_79 = arith.constant 4.800000e+01 : f32
        %115 = vector.broadcast %cst_79 : f32 to vector<8x1xf32>
        %116 = arith.divf %114, %115 : vector<8x1xf32>
        %117 = vector.broadcast %116 : vector<8x1xf32> to vector<8x48xf32>
        %118 = arith.subf %112, %117 : vector<8x48xf32>
        %119 = arith.mulf %118, %118 : vector<8x48xf32>
        %cst_80 = arith.constant dense<0.000000e+00> : vector<8xf32>
        %120 = vector.multi_reduction <add>, %119, %cst_80 [1] : vector<8x48xf32> to vector<8xf32>
        %121 = vector.shape_cast %120 : vector<8xf32> to vector<8x1xf32>
        %cst_81 = arith.constant 4.800000e+01 : f32
        %122 = vector.broadcast %cst_81 : f32 to vector<8x1xf32>
        %123 = arith.divf %121, %122 : vector<8x1xf32>
        %124 = vector.broadcast %116 : vector<8x1xf32> to vector<8x48xf32>
        %125 = arith.subf %112, %124 : vector<8x48xf32>
        %cst_82 = arith.constant 9.99999974E-6 : f32
        %126 = vector.broadcast %cst_82 : f32 to vector<8x1xf32>
        %127 = arith.addf %123, %126 : vector<8x1xf32>
        %128 = math.rsqrt %127 : vector<8x1xf32>
        %129 = vector.broadcast %128 : vector<8x1xf32> to vector<8x48xf32>
        %130 = arith.mulf %125, %129 : vector<8x48xf32>
        %131 = vector.broadcast %0 : vector<1x48xf32> to vector<8x48xf32>
        %132 = arith.mulf %130, %131 : vector<8x48xf32>
        %133 = vector.broadcast %1 : vector<1x48xf32> to vector<8x48xf32>
        %134 = arith.addf %132, %133 : vector<8x48xf32>
        %c0_83 = arith.constant 0 : index
        %c0_84 = arith.constant 0 : index
        %135 = vector.load %arg6[%c0_83, %c0_84] : memref<48x96xf32, #tpu.memory_space<vmem>>, vector<48x96xf32>
        %cst_85 = arith.constant dense<0.000000e+00> : vector<8x96xf32>
        %136 = tpu.matmul %134, %135, %cst_85 {dimension_numbers = #tpu.dot_dimension_numbers<[1], [0], [0], [1], [0, 0, 1, 1], [], []>} : vector<8x48xf32>, vector<48x96xf32>, vector<8x96xf32> -> vector<8x96xf32>
        %137 = vector.extract_strided_slice %136 {offsets = [0, 0], sizes = [8, 48], strides = [1, 1]} : vector<8x96xf32> to vector<8x48xf32>
        %138 = vector.shape_cast %137 : vector<8x48xf32> to vector<8x6x8xf32>
        %139 = vector.extract_strided_slice %136 {offsets = [0, 48], sizes = [8, 48], strides = [1, 1]} : vector<8x96xf32> to vector<8x48xf32>
        %140 = vector.shape_cast %139 : vector<8x48xf32> to vector<8x6x8xf32>
        %141 = tpu.transpose %138, [1, 0, 2] : vector<8x6x8xf32> -> vector<6x8x8xf32>
        %c0_86 = arith.constant 0 : index
        %142 = arith.index_cast %109 : i32 to index
        %c0_87 = arith.constant 0 : index
        %143 = vector.load %arg16[%c0_86, %142, %c0_87] : memref<6x16x8xf32, #tpu.memory_space<vmem>>, vector<6x8x8xf32>
        tpu.vector_store %arg16[%c0_86, %142, %c0_87], %141 {strides = array<i32>} : memref<6x16x8xf32, #tpu.memory_space<vmem>>, vector<6x8x8xf32>,
        %144 = tpu.transpose %140, [1, 0, 2] : vector<8x6x8xf32> -> vector<6x8x8xf32>
        %c0_88 = arith.constant 0 : index
        %145 = arith.index_cast %109 : i32 to index
        %c0_89 = arith.constant 0 : index
        %146 = vector.load %arg17[%c0_88, %145, %c0_89] : memref<6x16x8xf32, #tpu.memory_space<vmem>>, vector<6x8x8xf32>
        tpu.vector_store %arg17[%c0_88, %145, %c0_89], %144 {strides = array<i32>} : memref<6x16x8xf32, #tpu.memory_space<vmem>>, vector<6x8x8xf32>,
      }
      %c2_i32_72 = arith.constant 2 : i32
    } else {
    }
    %c8_i32 = arith.constant 8 : i32
    %5 = arith.muli %arg1, %c8_i32 : i32
    %6 = tpu.assume_multiple %5, 8 : i32
    %c0_4 = arith.constant 0 : index
    %7 = arith.index_cast %6 : i32 to index
    %c0_5 = arith.constant 0 : index
    %8 = vector.load %arg2[%c0_4, %7, %c0_5] : memref<1x16x48xf32, #tpu.memory_space<vmem>>, vector<1x8x48xf32>
    %9 = vector.shape_cast %8 : vector<1x8x48xf32> to vector<8x48xf32>
    %cst = arith.constant dense<0.000000e+00> : vector<8xf32>
    %10 = vector.multi_reduction <add>, %9, %cst [1] : vector<8x48xf32> to vector<8xf32>
    %11 = vector.shape_cast %10 : vector<8xf32> to vector<8x1xf32>
    %cst_6 = arith.constant 4.800000e+01 : f32
    %12 = vector.broadcast %cst_6 : f32 to vector<8x1xf32>
    %13 = arith.divf %11, %12 : vector<8x1xf32>
    %14 = vector.broadcast %13 : vector<8x1xf32> to vector<8x48xf32>
    %15 = arith.subf %9, %14 : vector<8x48xf32>
    %16 = arith.mulf %15, %15 : vector<8x48xf32>
    %cst_7 = arith.constant dense<0.000000e+00> : vector<8xf32>
    %17 = vector.multi_reduction <add>, %16, %cst_7 [1] : vector<8x48xf32> to vector<8xf32>
    %18 = vector.shape_cast %17 : vector<8xf32> to vector<8x1xf32>
    %cst_8 = arith.constant 4.800000e+01 : f32
    %19 = vector.broadcast %cst_8 : f32 to vector<8x1xf32>
    %20 = arith.divf %18, %19 : vector<8x1xf32>
    %21 = vector.broadcast %13 : vector<8x1xf32> to vector<8x48xf32>
    %22 = arith.subf %9, %21 : vector<8x48xf32>
    %cst_9 = arith.constant 9.99999974E-6 : f32
    %23 = vector.broadcast %cst_9 : f32 to vector<8x1xf32>
    %24 = arith.addf %20, %23 : vector<8x1xf32>
    %25 = math.rsqrt %24 : vector<8x1xf32>
    %26 = vector.broadcast %25 : vector<8x1xf32> to vector<8x48xf32>
    %27 = arith.mulf %22, %26 : vector<8x48xf32>
    %28 = vector.broadcast %0 : vector<1x48xf32> to vector<8x48xf32>
    %29 = arith.mulf %27, %28 : vector<8x48xf32>
    %30 = vector.broadcast %1 : vector<1x48xf32> to vector<8x48xf32>
    %31 = arith.addf %29, %30 : vector<8x48xf32>
    %c0_10 = arith.constant 0 : index
    %c0_11 = arith.constant 0 : index
    %32 = vector.load %arg5[%c0_10, %c0_11] : memref<48x48xf32, #tpu.memory_space<vmem>>, vector<48x48xf32>
    %cst_12 = arith.constant dense<0.000000e+00> : vector<8x48xf32>
    %33 = tpu.matmul %31, %32, %cst_12 {dimension_numbers = #tpu.dot_dimension_numbers<[1], [0], [0], [1], [0, 0, 1, 1], [], []>} : vector<8x48xf32>, vector<48x48xf32>, vector<8x48xf32> -> vector<8x48xf32>
    %cst_13 = arith.constant 0.144337565 : f32
    %34 = vector.broadcast %cst_13 : f32 to vector<8x48xf32>
    %35 = arith.mulf %33, %34 : vector<8x48xf32>
    %36 = vector.shape_cast %35 : vector<8x48xf32> to vector<8x6x8xf32>
    %37 = tpu.transpose %36, [1, 0, 2] : vector<8x6x8xf32> -> vector<6x8x8xf32>
    %cst_14 = arith.constant -1.000000e+30 : f32
    %38 = vector.broadcast %cst_14 : f32 to vector<6x8x1xf32>
    %c0_15 = arith.constant 0 : index
    %c0_16 = arith.constant 0 : index
    %c0_17 = arith.constant 0 : index
    %39 = vector.load %arg18[%c0_15, %c0_16, %c0_17] : memref<6x8x1xf32, #tpu.memory_space<vmem>>, vector<6x8x1xf32>
    tpu.vector_store %arg18[%c0_15, %c0_16, %c0_17], %38 {strides = array<i32>} : memref<6x8x1xf32, #tpu.memory_space<vmem>>, vector<6x8x1xf32>,
    %cst_18 = arith.constant 0.000000e+00 : f32
    %40 = vector.broadcast %cst_18 : f32 to vector<6x8x1xf32>
    %c0_19 = arith.constant 0 : index
    %c0_20 = arith.constant 0 : index
    %c0_21 = arith.constant 0 : index
    %41 = vector.load %arg19[%c0_19, %c0_20, %c0_21] : memref<6x8x1xf32, #tpu.memory_space<vmem>>, vector<6x8x1xf32>
    tpu.vector_store %arg19[%c0_19, %c0_20, %c0_21], %40 {strides = array<i32>} : memref<6x8x1xf32, #tpu.memory_space<vmem>>, vector<6x8x1xf32>,
    %cst_22 = arith.constant 0.000000e+00 : f32
    %42 = vector.broadcast %cst_22 : f32 to vector<6x8x8xf32>
    %c0_23 = arith.constant 0 : index
    %c0_24 = arith.constant 0 : index
    %c0_25 = arith.constant 0 : index
    %43 = vector.load %arg20[%c0_23, %c0_24, %c0_25] : memref<6x8x8xf32, #tpu.memory_space<vmem>>, vector<6x8x8xf32>
    tpu.vector_store %arg20[%c0_23, %c0_24, %c0_25], %42 {strides = array<i32>} : memref<6x8x8xf32, #tpu.memory_space<vmem>>, vector<6x8x8xf32>,
    %44 = tpu.iota {dimensions = array<i32: 0>} : vector<8x8xi32>
    %45 = vector.broadcast %6 : i32 to vector<8x8xi32>
    %46 = arith.addi %45, %44 : vector<8x8xi32>
    %c1_i32 = arith.constant 1 : i32
    %47 = arith.addi %arg1, %c1_i32 : i32
    %c0_i32_26 = arith.constant 0 : i32
    %48 = arith.subi %47, %c0_i32_26 : i32
    %c1_i32_27 = arith.constant 1 : i32
    %c1_i32_28 = arith.constant 1 : i32
    %49 = arith.subi %c1_i32_27, %c1_i32_28 : i32
    %50 = arith.addi %48, %49 : i32
    %c1_i32_29 = arith.constant 1 : i32
    %51 = arith.divsi %50, %c1_i32_29 : i32
    %c1_i32_30 = arith.constant 1 : i32
    %c0_i32_31 = arith.constant 0 : i32
    %c0_i32_32 = arith.constant 0 : i32
    %52 = arith.subi %51, %c0_i32_32 : i32
    %53 = arith.addi %c0_i32_32, %52 : i32
    %c1_i32_33 = arith.constant 1 : i32
    scf.for %arg21 = %c0_i32_32 to %53 step %c1_i32_33  : i32 {
      %105 = arith.muli %arg21, %c1_i32_30 : i32
      %106 = arith.addi %c0_i32_31, %105 : i32
      %c8_i32_70 = arith.constant 8 : i32
      %107 = arith.muli %106, %c8_i32_70 : i32
      %108 = tpu.assume_multiple %107, 8 : i32
      %c0_71 = arith.constant 0 : index
      %109 = arith.index_cast %108 : i32 to index
      %c0_72 = arith.constant 0 : index
      %110 = vector.load %arg16[%c0_71, %109, %c0_72] : memref<6x16x8xf32, #tpu.memory_space<vmem>>, vector<6x8x8xf32>
      %c0_73 = arith.constant 0 : index
      %111 = arith.index_cast %108 : i32 to index
      %c0_74 = arith.constant 0 : index
      %112 = vector.load %arg17[%c0_73, %111, %c0_74] : memref<6x16x8xf32, #tpu.memory_space<vmem>>, vector<6x8x8xf32>
      "tpu.trace_start"() <{level = 10 : i32, message = "hqd,hkd->hqk"}> : () -> ()
      %cst_75 = arith.constant dense<0.000000e+00> : vector<6x8x8xf32>
      %113 = tpu.matmul %37, %110, %cst_75 {dimension_numbers = #tpu.dot_dimension_numbers<[2], [2], [1], [1], [0, 0, 0, 1, 1, 1], [0], [0]>} : vector<6x8x8xf32>, vector<6x8x8xf32>, vector<6x8x8xf32> -> vector<6x8x8xf32>
      "tpu.trace_stop"() : () -> ()
      %114 = tpu.iota {dimensions = array<i32: 1>} : vector<8x8xi32>
      %115 = vector.broadcast %108 : i32 to vector<8x8xi32>
      %116 = arith.addi %115, %114 : vector<8x8xi32>
      %117 = arith.cmpi sle, %116, %46 : vector<8x8xi32>
      %118 = vector.shape_cast %117 : vector<8x8xi1> to vector<1x8x8xi1>
      %cst_76 = arith.constant -1.000000e+30 : f32
      %119 = vector.shape_cast %118 : vector<1x8x8xi1> to vector<1x8x8xi1>
      %120 = vector.broadcast %119 : vector<1x8x8xi1> to vector<6x8x8xi1>
      %121 = vector.broadcast %cst_76 : f32 to vector<6x8x8xf32>
      %122 = arith.select %120, %113, %121 : vector<6x8x8xi1>, vector<6x8x8xf32>
      %c0_77 = arith.constant 0 : index
      %c0_78 = arith.constant 0 : index
      %c0_79 = arith.constant 0 : index
      %123 = vector.load %arg18[%c0_77, %c0_78, %c0_79] : memref<6x8x1xf32, #tpu.memory_space<vmem>>, vector<6x8x1xf32>
      %cst_80 = arith.constant dense<0xFF800000> : vector<6x8xf32>
      %124 = vector.multi_reduction <maximumf>, %122, %cst_80 [2] : vector<6x8x8xf32> to vector<6x8xf32>
      %125 = vector.shape_cast %124 : vector<6x8xf32> to vector<6x8x1xf32>
      %126 = arith.maximumf %123, %125 : vector<6x8x1xf32>
      %127 = arith.subf %123, %126 : vector<6x8x1xf32>
      %128 = math.exp %127 : vector<6x8x1xf32>
      %129 = vector.broadcast %126 : vector<6x8x1xf32> to vector<6x8x8xf32>
      %130 = arith.subf %122, %129 : vector<6x8x8xf32>
      %131 = math.exp %130 : vector<6x8x8xf32>
      %c0_81 = arith.constant 0 : index
      %c0_82 = arith.constant 0 : index
      %c0_83 = arith.constant 0 : index
      %132 = vector.load %arg19[%c0_81, %c0_82, %c0_83] : memref<6x8x1xf32, #tpu.memory_space<vmem>>, vector<6x8x1xf32>
      %133 = arith.mulf %128, %132 : vector<6x8x1xf32>
      %cst_84 = arith.constant dense<0.000000e+00> : vector<6x8xf32>
      %134 = vector.multi_reduction <add>, %131, %cst_84 [2] : vector<6x8x8xf32> to vector<6x8xf32>
      %135 = vector.shape_cast %134 : vector<6x8xf32> to vector<6x8x1xf32>
      %136 = arith.addf %133, %135 : vector<6x8x1xf32>
      %c0_85 = arith.constant 0 : index
      %c0_86 = arith.constant 0 : index
      %c0_87 = arith.constant 0 : index
      %137 = vector.load %arg19[%c0_85, %c0_86, %c0_87] : memref<6x8x1xf32, #tpu.memory_space<vmem>>, vector<6x8x1xf32>
      tpu.vector_store %arg19[%c0_85, %c0_86, %c0_87], %136 {strides = array<i32>} : memref<6x8x1xf32, #tpu.memory_space<vmem>>, vector<6x8x1xf32>,
      %c0_88 = arith.constant 0 : index
      %c0_89 = arith.constant 0 : index
      %c0_90 = arith.constant 0 : index
      %138 = vector.load %arg20[%c0_88, %c0_89, %c0_90] : memref<6x8x8xf32, #tpu.memory_space<vmem>>, vector<6x8x8xf32>
      %139 = vector.broadcast %128 : vector<6x8x1xf32> to vector<6x8x8xf32>
      %140 = arith.mulf %139, %138 : vector<6x8x8xf32>
      "tpu.trace_start"() <{level = 10 : i32, message = "hqk,hkd->hqd"}> : () -> ()
      %cst_91 = arith.constant dense<0.000000e+00> : vector<6x8x8xf32>
      %141 = tpu.matmul %131, %112, %cst_91 {dimension_numbers = #tpu.dot_dimension_numbers<[2], [1], [1], [2], [0, 0, 0, 1, 1, 2], [0], [0]>} : vector<6x8x8xf32>, vector<6x8x8xf32>, vector<6x8x8xf32> -> vector<6x8x8xf32>
      "tpu.trace_stop"() : () -> ()
      %142 = arith.addf %140, %141 : vector<6x8x8xf32>
      %c0_92 = arith.constant 0 : index
      %c0_93 = arith.constant 0 : index
      %c0_94 = arith.constant 0 : index
      %143 = vector.load %arg20[%c0_92, %c0_93, %c0_94] : memref<6x8x8xf32, #tpu.memory_space<vmem>>, vector<6x8x8xf32>
      tpu.vector_store %arg20[%c0_92, %c0_93, %c0_94], %142 {strides = array<i32>} : memref<6x8x8xf32, #tpu.memory_space<vmem>>, vector<6x8x8xf32>,
      %c0_95 = arith.constant 0 : index
      %c0_96 = arith.constant 0 : index
      %c0_97 = arith.constant 0 : index
      %144 = vector.load %arg18[%c0_95, %c0_96, %c0_97] : memref<6x8x1xf32, #tpu.memory_space<vmem>>, vector<6x8x1xf32>
      tpu.vector_store %arg18[%c0_95, %c0_96, %c0_97], %126 {strides = array<i32>} : memref<6x8x1xf32, #tpu.memory_space<vmem>>, vector<6x8x1xf32>,
    }
    %c0_34 = arith.constant 0 : index
    %c0_35 = arith.constant 0 : index
    %c0_36 = arith.constant 0 : index
    %54 = vector.load %arg20[%c0_34, %c0_35, %c0_36] : memref<6x8x8xf32, #tpu.memory_space<vmem>>, vector<6x8x8xf32>
    %c0_37 = arith.constant 0 : index
    %c0_38 = arith.constant 0 : index
    %c0_39 = arith.constant 0 : index
    %55 = vector.load %arg19[%c0_37, %c0_38, %c0_39] : memref<6x8x1xf32, #tpu.memory_space<vmem>>, vector<6x8x1xf32>
    %56 = vector.broadcast %55 : vector<6x8x1xf32> to vector<6x8x8xf32>
    %57 = arith.divf %54, %56 : vector<6x8x8xf32>
    %c0_40 = arith.constant 0 : index
    %c0_41 = arith.constant 0 : index
    %c0_42 = arith.constant 0 : index
    %58 = vector.load %arg7[%c0_40, %c0_41, %c0_42] : memref<6x8x48xf32, #tpu.memory_space<vmem>>, vector<6x8x48xf32>
    "tpu.trace_start"() <{level = 10 : i32, message = "hqd,hdc->hqc"}> : () -> ()
    %cst_43 = arith.constant dense<0.000000e+00> : vector<6x8x48xf32>
    %59 = tpu.matmul %57, %58, %cst_43 {dimension_numbers = #tpu.dot_dimension_numbers<[2], [1], [1], [2], [0, 0, 0, 1, 1, 2], [0], [0]>} : vector<6x8x8xf32>, vector<6x8x48xf32>, vector<6x8x48xf32> -> vector<6x8x48xf32>
    "tpu.trace_stop"() : () -> ()
    %cst_44 = arith.constant dense<0.000000e+00> : vector<8x48xf32>
    %60 = vector.multi_reduction <add>, %59, %cst_44 [0] : vector<6x8x48xf32> to vector<8x48xf32>
    %c0_45 = arith.constant 0 : index
    %c0_46 = arith.constant 0 : index
    %61 = vector.load %arg8[%c0_45, %c0_46] : memref<1x48xf32, #tpu.memory_space<vmem>>, vector<1x48xf32>
    %62 = vector.broadcast %61 : vector<1x48xf32> to vector<8x48xf32>
    %63 = arith.addf %60, %62 : vector<8x48xf32>
    %64 = arith.addf %9, %63 : vector<8x48xf32>
    %c0_47 = arith.constant 0 : index
    %c0_48 = arith.constant 0 : index
    %65 = vector.load %arg9[%c0_47, %c0_48] : memref<1x48xf32, #tpu.memory_space<vmem>>, vector<1x48xf32>
    %c0_49 = arith.constant 0 : index
    %c0_50 = arith.constant 0 : index
    %66 = vector.load %arg10[%c0_49, %c0_50] : memref<1x48xf32, #tpu.memory_space<vmem>>, vector<1x48xf32>
    %cst_51 = arith.constant dense<0.000000e+00> : vector<8xf32>
    %67 = vector.multi_reduction <add>, %64, %cst_51 [1] : vector<8x48xf32> to vector<8xf32>
    %68 = vector.shape_cast %67 : vector<8xf32> to vector<8x1xf32>
    %cst_52 = arith.constant 4.800000e+01 : f32
    %69 = vector.broadcast %cst_52 : f32 to vector<8x1xf32>
    %70 = arith.divf %68, %69 : vector<8x1xf32>
    %71 = vector.broadcast %70 : vector<8x1xf32> to vector<8x48xf32>
    %72 = arith.subf %64, %71 : vector<8x48xf32>
    %73 = arith.mulf %72, %72 : vector<8x48xf32>
    %cst_53 = arith.constant dense<0.000000e+00> : vector<8xf32>
    %74 = vector.multi_reduction <add>, %73, %cst_53 [1] : vector<8x48xf32> to vector<8xf32>
    %75 = vector.shape_cast %74 : vector<8xf32> to vector<8x1xf32>
    %cst_54 = arith.constant 4.800000e+01 : f32
    %76 = vector.broadcast %cst_54 : f32 to vector<8x1xf32>
    %77 = arith.divf %75, %76 : vector<8x1xf32>
    %78 = vector.broadcast %70 : vector<8x1xf32> to vector<8x48xf32>
    %79 = arith.subf %64, %78 : vector<8x48xf32>
    %cst_55 = arith.constant 9.99999974E-6 : f32
    %80 = vector.broadcast %cst_55 : f32 to vector<8x1xf32>
    %81 = arith.addf %77, %80 : vector<8x1xf32>
    %82 = math.rsqrt %81 : vector<8x1xf32>
    %83 = vector.broadcast %82 : vector<8x1xf32> to vector<8x48xf32>
    %84 = arith.mulf %79, %83 : vector<8x48xf32>
    %85 = vector.broadcast %65 : vector<1x48xf32> to vector<8x48xf32>
    %86 = arith.mulf %84, %85 : vector<8x48xf32>
    %87 = vector.broadcast %66 : vector<1x48xf32> to vector<8x48xf32>
    %88 = arith.addf %86, %87 : vector<8x48xf32>
    %c0_56 = arith.constant 0 : index
    %c0_57 = arith.constant 0 : index
    %89 = vector.load %arg11[%c0_56, %c0_57] : memref<48x192xf32, #tpu.memory_space<vmem>>, vector<48x192xf32>
    %cst_58 = arith.constant dense<0.000000e+00> : vector<8x192xf32>
    %90 = tpu.matmul %88, %89, %cst_58 {dimension_numbers = #tpu.dot_dimension_numbers<[1], [0], [0], [1], [0, 0, 1, 1], [], []>} : vector<8x48xf32>, vector<48x192xf32>, vector<8x192xf32> -> vector<8x192xf32>
    %c0_59 = arith.constant 0 : index
    %c0_60 = arith.constant 0 : index
    %91 = vector.load %arg12[%c0_59, %c0_60] : memref<1x192xf32, #tpu.memory_space<vmem>>, vector<1x192xf32>
    %92 = vector.broadcast %91 : vector<1x192xf32> to vector<8x192xf32>
    %93 = arith.addf %90, %92 : vector<8x192xf32>
    %cst_61 = arith.constant 0.000000e+00 : f32
    %94 = vector.broadcast %cst_61 : f32 to vector<8x192xf32>
    %95 = arith.maximumf %93, %94 : vector<8x192xf32>
    %c0_62 = arith.constant 0 : index
    %c0_63 = arith.constant 0 : index
    %96 = vector.load %arg13[%c0_62, %c0_63] : memref<192x48xf32, #tpu.memory_space<vmem>>, vector<192x48xf32>
    %cst_64 = arith.constant dense<0.000000e+00> : vector<8x48xf32>
    %97 = tpu.matmul %95, %96, %cst_64 {dimension_numbers = #tpu.dot_dimension_numbers<[1], [0], [0], [1], [0, 0, 1, 1], [], []>} : vector<8x192xf32>, vector<192x48xf32>, vector<8x48xf32> -> vector<8x48xf32>
    %c0_65 = arith.constant 0 : index
    %c0_66 = arith.constant 0 : index
    %98 = vector.load %arg14[%c0_65, %c0_66] : memref<1x48xf32, #tpu.memory_space<vmem>>, vector<1x48xf32>
    %99 = vector.broadcast %98 : vector<1x48xf32> to vector<8x48xf32>
    %100 = arith.addf %97, %99 : vector<8x48xf32>
    %101 = arith.addf %64, %100 : vector<8x48xf32>
    %c0_67 = arith.constant 0 : index
    %c0_68 = arith.constant 0 : index
    %c0_69 = arith.constant 0 : index
    %102 = vector.load %arg15[%c0_67, %c0_68, %c0_69] : memref<1x8x48xf32, #tpu.memory_space<vmem>>, vector<1x8x48xf32>
    %103 = vector.shape_cast %102 : vector<1x8x48xf32> to vector<8x48xf32>
    %104 = vector.shape_cast %101 : vector<8x48xf32> to vector<1x8x48xf32>
    tpu.vector_store %arg15[%c0_67, %c0_68, %c0_69], %104 {strides = array<i32>} : memref<1x8x48xf32, #tpu.memory_space<vmem>>, vector<1x8x48xf32>,
    return
  }
  func.func @transform_0(%arg0: i32, %arg1: i32) -> (i32, i32, i32) {
    %c0_i32 = arith.constant 0 : i32
    %c0_i32_0 = arith.constant 0 : i32
    %c0_i32_1 = arith.constant 0 : i32
    return %arg0, %c0_i32, %c0_i32_0 : i32, i32, i32
  }
  func.func @transform_1(%arg0: i32, %arg1: i32) -> (i32, i32) {
    %c0_i32 = arith.constant 0 : i32
    %c0_i32_0 = arith.constant 0 : i32
    %c0_i32_1 = arith.constant 0 : i32
    return %c0_i32, %c0_i32_0 : i32, i32
  }
  func.func @transform_2(%arg0: i32, %arg1: i32) -> (i32, i32) {
    %c0_i32 = arith.constant 0 : i32
    %c0_i32_0 = arith.constant 0 : i32
    %c0_i32_1 = arith.constant 0 : i32
    return %c0_i32, %c0_i32_0 : i32, i32
  }
  func.func @transform_3(%arg0: i32, %arg1: i32) -> (i32, i32) {
    %c0_i32 = arith.constant 0 : i32
    %c0_i32_0 = arith.constant 0 : i32
    %c0_i32_1 = arith.constant 0 : i32
    return %c0_i32, %c0_i32_0 : i32, i32
  }
  func.func @transform_4(%arg0: i32, %arg1: i32) -> (i32, i32) {
    %c0_i32 = arith.constant 0 : i32
    %c0_i32_0 = arith.constant 0 : i32
    %c0_i32_1 = arith.constant 0 : i32
    return %c0_i32, %c0_i32_0 : i32, i32
  }
  func.func @transform_5(%arg0: i32, %arg1: i32) -> (i32, i32, i32) {
    %c0_i32 = arith.constant 0 : i32
    %c0_i32_0 = arith.constant 0 : i32
    %c0_i32_1 = arith.constant 0 : i32
    %c0_i32_2 = arith.constant 0 : i32
    return %c0_i32, %c0_i32_0, %c0_i32_1 : i32, i32, i32
  }
  func.func @transform_6(%arg0: i32, %arg1: i32) -> (i32, i32) {
    %c0_i32 = arith.constant 0 : i32
    %c0_i32_0 = arith.constant 0 : i32
    %c0_i32_1 = arith.constant 0 : i32
    return %c0_i32, %c0_i32_0 : i32, i32
  }
  func.func @transform_7(%arg0: i32, %arg1: i32) -> (i32, i32) {
    %c0_i32 = arith.constant 0 : i32
    %c0_i32_0 = arith.constant 0 : i32
    %c0_i32_1 = arith.constant 0 : i32
    return %c0_i32, %c0_i32_0 : i32, i32
  }
  func.func @transform_8(%arg0: i32, %arg1: i32) -> (i32, i32) {
    %c0_i32 = arith.constant 0 : i32
    %c0_i32_0 = arith.constant 0 : i32
    %c0_i32_1 = arith.constant 0 : i32
    return %c0_i32, %c0_i32_0 : i32, i32
  }
  func.func @transform_9(%arg0: i32, %arg1: i32) -> (i32, i32) {
    %c0_i32 = arith.constant 0 : i32
    %c0_i32_0 = arith.constant 0 : i32
    %c0_i32_1 = arith.constant 0 : i32
    return %c0_i32, %c0_i32_0 : i32, i32
  }
  func.func @transform_10(%arg0: i32, %arg1: i32) -> (i32, i32) {
    %c0_i32 = arith.constant 0 : i32
    %c0_i32_0 = arith.constant 0 : i32
    %c0_i32_1 = arith.constant 0 : i32
    return %c0_i32, %c0_i32_0 : i32, i32
  }
  func.func @transform_11(%arg0: i32, %arg1: i32) -> (i32, i32) {
    %c0_i32 = arith.constant 0 : i32
    %c0_i32_0 = arith.constant 0 : i32
    %c0_i32_1 = arith.constant 0 : i32
    return %c0_i32, %c0_i32_0 : i32, i32
  }
  func.func @transform_12(%arg0: i32, %arg1: i32) -> (i32, i32) {
    %c0_i32 = arith.constant 0 : i32
    %c0_i32_0 = arith.constant 0 : i32
    %c0_i32_1 = arith.constant 0 : i32
    return %c0_i32, %c0_i32_0 : i32, i32
  }
  func.func @transform_13(%arg0: i32, %arg1: i32) -> (i32, i32, i32) {
    %c0_i32 = arith.constant 0 : i32
    %c0_i32_0 = arith.constant 0 : i32
    return %arg0, %arg1, %c0_i32 : i32, i32, i32
  }
}

</mosaic_0001>

<bundles_post_ra>
// kernel: tpu_custom_call.1
= control target key start
LH: loop header
LB: loop body
LE: loop exit
PB: predicated region body
PF: predicated region fallthrough
CT: control target
= control target key end

     0   :  { %18 = vsyncpa [#allocation8], 0  ;;  %s4938_s0 = inlined_call_operand.vmem [shape: f32[2,16,48], index: 0, kind: input, shape index: {}]   ;;  %s4939_s1 = inlined_call_operand.vmem [shape: f32[1,48], index: 1, kind: input, shape index: {}]   ;;  %s4940_s2 = inlined_call_operand.vmem [shape: f32[1,48], index: 2, kind: input, shape index: {}]   ;;  %s4941_s3 = inlined_call_operand.vmem [shape: f32[48,48], index: 3, kind: input, shape index: {}]   ;;  %s4942_s4 = inlined_call_operand.vmem [shape: f32[48,96], index: 4, kind: input, shape index: {}]   ;;  %s4943_s5 = inlined_call_operand.vmem [shape: f32[6,8,48], index: 5, kind: input, shape index: {}]   ;;  %s4944_s6 = inlined_call_operand.vmem [shape: f32[1,48], index: 6, kind: input, shape index: {}]   ;;  %s4945_s7 = inlined_call_operand.vmem [shape: f32[1,48], index: 7, kind: input, shape index: {}]   ;;  %s4946_s8 = inlined_call_operand.vmem [shape: f32[1,48], index: 8, kind: input, shape index: {}]   ;;  %s4947_s9 = inlined_call_operand.vmem [shape: f32[48,192], index: 9, kind: input, shape index: {}]   ;;  %s4948_s10 = inlined_call_operand.vmem [shape: f32[1,192], index: 10, kind: input, shape index: {}]   ;;  %s4949_s11 = inlined_call_operand.vmem [shape: f32[192,48], index: 11, kind: input, shape index: {}]   ;;  %s4950_s12 = inlined_call_operand.vmem [shape: f32[1,48], index: 12, kind: input, shape index: {}]   ;;  %s4951_s13 = inlined_call_operand.hbm [shape: f32[2,16,48], index: 13, kind: output, shape index: {}]  }
   0x1   :  { %20 = vsyncpa [#allocation8 + $0x1], 0  ;;  %s4131_s25 = smov 0   ;;  %s4133_s26 = smov 0  }
   0x2   :  { %s4135_s27 = smov 0   ;;  %s4137_s28 = smov 0  }
   0x3   :  { %s4139_s29 = smov 0   ;;  %s4141_s30 = smov 0  }
   0x4   :  { %s4143_s14 = smov 0   ;;  %s4145_s15 = smov 0  }
   0x5 LB: > { %4960 = sst [smem:[#allocation10_spill]] %s3998_s25  ;;  %s3524_s16 = sadd.s32 4294967295, %s4026_s15   ;;  %s4026_s15 = sphi %s4145_s15, %s26_s15   ;;  %s4022_s14 = sphi %s4143_s14, %s4980_s14   ;;  %s4018_s30 = sphi %s4141_s30, %s4979_s30   ;;  %s4014_s29 = sphi %s4139_s29, %s4978_s29   ;;  %s4010_s28 = sphi %s4137_s28, %s4977_s28   ;;  %s4006_s27 = sphi %s4135_s27, %s4976_s27   ;;  %s4002_s26 = sphi %s4133_s26, %s4982_s26   ;;  %s3998_s25 = sphi %s4131_s25, %s4981_s25  }
   0x6   : > { %4961 = sst [smem:[#allocation11_spill]] %s4006_s27  ;;  %s3525_s17 = sadd.s32 4294967294, %s4026_s15  }
   0x7   : > { %4962 = sst [smem:[#allocation12_spill]] %s4018_s30  ;;  %s35_s18 = sadd.s32 1, %s4018_s30 }
   0x8   : > { %4963 = sst [smem:[#allocation13_spill]] %s4022_s14  ;;  %p36_p0 = scmp.ge.s32.totalorder %s35_s18, 2 }
   0x9   : > { %s38_s19 = sadd.s32 1, %s4022_s14  ;;  %p335_p1 = scmp.ne.s32.totalorder %s4006_s27, %s4002_s26 }
   0xa   : > { %p336_p2 = scmp.eq.s32.totalorder %s3524_s16, 3  ;;  %s4984_s18 = smov (%p36_p0, %s35_s18), 0 }
   0xb   : > { %4964 = sst [smem:[#allocation14_spill]] %s4984_s18  ;;  %s4986_s19 = smov (!%p36_p0, %s38_s19), %s4022_s14 }
   0xc   : > { %s321_s20 = ssub.s32 %s4018_s30, %s4984_s18  ;;  %p4182_p3 = por %p336_p2, %p335_p1 }
   0xd   : > { %p40_p4 = scmp.ge.s32.totalorder %s4986_s19, 2  ;;  %p341_p5 = scmp.ne.s32.totalorder %s4002_s26, %s3998_s25 }
   0xe   : > { %p342_p6 = scmp.eq.s32.totalorder %s3525_s17, 3  ;;  %p3528_p7 = scmp.ge.s32.totalorder %s4026_s15, 1 }
   0xf   : > { %s4988_s19 = smov (%p40_p4, %s4986_s19), 0  ;;  %p404_p9 = scmp.lt.s32.totalorder %s4026_s15, 5 }
  0x10   : > { %4966 = sst [smem:[#allocation15_spill]] %s4988_s19  ;;  %p4191_p8 = por %p342_p6, %p341_p5 }
  0x11   : > { %s320_s23 = ssub.s32 %s4022_s14, %s4988_s19  ;;  %s325_s24 = sadd.s32 1, %s4006_s27 }
  0x12   : > { %s4967_s22 = scalar_select %p4191_p8, 1, 0 }
  0x13   : > { %s322_s16 = sor.u32 %s321_s20, %s320_s23  ;;  %p405_p10 = pnand %p3528_p7, %p404_p9 }
  0x14   : > { %4968 = sst [smem:[#allocation16_spill]] %s4967_s22  ;;  %p323_p11 = scmp.eq.s32.totalorder %s322_s16, 0 }
  0x15   : > { %408 = sbr.rel (%p405_p10) target bundleno = 3228 (0xc9c), region = 72  ;;  %s4959_s17 = sand.u32 (!%p405_p10), 1, %s4002_s26  }
  0x16   : > { %s4200_s18 = scalar_select %p323_p11, %s4006_s27, %s325_s24  }
  0x17   : > { %p448_p12 = scmp.lt.s32.totalorder (!%p405_p10), %s4014_s29, 1  ;;  %s4216_s20 = sshll.u32 (!%p405_p10), %s4959_s17, 3 }
  0x18   : > { %4969 = sst [smem:[#allocation17_spill]] %s4200_s18  ;;  %s447_s27 = scalar_lea.vmem (!%p405_p10), [#allocation7], %s4216_s20 }
  0x19   : > { %p3532_p13 = scmp.ne.s32.totalorder (!%p405_p10), %s4010_s28, 0 }
  0x1a   : > { %v4207_v0 = vld [vmem:[%s4939_s1] sm:$0x1]  ;;  %s449_s23 = scalar_select %p448_p12, %s4014_s29, 1 }
  0x1b   : > { %v4212_v1 = vld [vmem:[%s4940_s2] sm:$0x1]  ;;  %458 = sbr.rel (%p3532_p13) target bundleno = 798 (0x31e), region = 76  ;;  %s4226_s25 = smov (!%p3532_p13), 0  }
  0x1c   : > { %s3598_s24 = sshll.u32 %s449_s23, 4 }
  0x1d   : > { %s4222_s18 = scalar_lea.vmem %s4938_s0, %s3598_s24 }
  0x20 LB: >> { %s4232_s30 = sshll.u32 %s4030_s25, 3  ;;  %vm468_vm0 = vcmask 392192   ;;  %v502_v9 = vld [vmem:[%s4942_s4 + $0x28] sm:$0xff]  ;;  %v4036_v10 = vmov 0.0   ;;  %v501_v11 = vld [vmem:[%s4942_s4 + $0x20] sm:$0xff]  ;;  %vm4037_vm1 = vmmov 0   ;;  %v484_v19 = vlaneseq  ;;  %s4030_s25 = sphi %s4226_s25, %s464_s25  }
  0x21   : >> { %s466_s14 = scalar_lea.vmem %s4222_s18, %s4232_s30  ;;  %3649 = vmatprep.subr.mxu0 %v4036_v10  ;;  %3661 = vmatprep.mubr.msk.f32.mxu0 %vm4037_vm1, %v4036_v10  ;;  %v500_v12 = vld [vmem:[%s4942_s4 + $0x18] sm:$0xff]  ;;  %v499_v13 = vld [vmem:[%s4942_s4 + $0x10] sm:$0xff]  ;;  %v498_v14 = vld [vmem:[%s4942_s4 + $0x8] sm:$0xff]  ;;  %s4038_s17 = smov 104   ;;  %v4044_v30 = vmov 1983009808  }
  0x22   : >> { %v467_v2 = vld [vmem:[%s466_s14] sm:$0xff]  ;;  %3650 = vmatpush3.msra.mxu0 %v502_v9  ;;  %v485_v20 = vshrl.u32 %v484_v19, 7  ;;  %s4039_s14 = smov 120   ;;  %s4040_s19 = smov 112   ;;  %v595_v31 = vunpack.c.l.s4 %v4044_v30  ;;  %v4045_v32 = vmov 1934713408  }
  0x23   : >> { %v469_v3 = vsel %vm468_vm0, %v467_v2, 0.0  ;;  %3651 = vmatprep.subr.mxu0 %v4036_v10  ;;  %v497_v15 = vld [vmem:[%s4942_s4] sm:$0xff]  ;;  %s4041_s22 = smov 96   ;;  %s4042_s23 = smov 88   ;;  %v657_v33 = vunpack.c.l.s4 %v4045_v32  ;;  %vm997_vm2 = vcmask 64512  }
  0x24   : >> { %470 = vadd.xlane.f32.xlu0 %v469_v3  ;;  %3652 = vmatpush3.msra.mxu0 %v501_v11  ;;  %v486_v21 = vsub.s32 0, %v485_v20  ;;  %s4043_s24 = smov 80   ;;  %v596_v34 = vunpack.c.0.s8 %v595_v31  ;;  %s996_s16 = scalar_lea.vmem [#allocation2], %s4232_s30 }
  0x25   : >> { %3653 = vmatprep.subr.mxu0 %v4036_v10  ;;  %v658_v37 = vunpack.c.0.s8 %v657_v33  ;;  %s464_s25 = sadd.s32 1, %s4030_s25  }
  0x26   : >> { %3654 = vmatpush3.msra.mxu0 %v500_v12  ;;  %v487_v22 = vrot.slane %v4207_v0, %v486_v21  ;;  %v494_v25 = vrot.slane %v4212_v1, %v486_v21  ;;  %v4268_v38 = vsub.s32 %v596_v34, %v485_v20  ;;  %p461_p0 = scmp.ge.s32.totalorder %s464_s25, 2  }
  0x27   : >> { %3655 = vmatprep.subr.mxu0 %v4036_v10  ;;  %v4271_v44 = vsub.s32 %v658_v37, %v485_v20 }
  0x28   : >> { %3656 = vmatpush3.msra.mxu0 %v499_v13 }
  0x29   : >> { %3657 = vmatprep.subr.mxu0 %v4036_v10 }
  0x2a   : >> { %3658 = vmatpush3.msra.mxu0 %v498_v14 }
  0x2b   : >> { %3659 = vmatprep.subr.mxu0 %v4036_v10 }
  0x2c   : >> { %3660 = vmatpush3.msra.mxu0 %v497_v15 }
  0xad   : >> { %v471_v4 = vpop.xlane.xlu0 %470 }
  0xae   : >> { %v473_v5 = vmul.f32 0.020833334, %v471_v4 }
  0xb0   : >> { %v474_v6 = vsub.f32 %v467_v2, %v473_v5 }
  0xb2   : >> { %v475_v7 = vmul.f32 %v474_v6, %v474_v6 }
  0xb4   : >> { %v476_v8 = vsel %vm468_vm0, %v475_v7, 0.0 }
  0xb5   : >> { %477 = vadd.xlane.f32.xlu0 %v476_v8 }
 0x13e   : >> { %v478_v16 = vpop.xlane.xlu0 %477 }
 0x13f   : >> { %v479_v17 = vmul.f32 0.020833334, %v478_v16 }
 0x141   : >> { %v480_v18 = vadd.f32 1e-05, %v479_v17 }
 0x143   : >> { %3880 = vrsqrt.f32 %v480_v18 }
 0x150   : >> { %v3881_v23 = vpop.eup %3880 }
 0x151   : >> { %v482_v24 = vmul.f32 %v3881_v23, %v474_v6 }
 0x153   : >> { %v489_v26 = vmul.f32 %v487_v22, %v482_v24 }
 0x155   : >> { %v496_v27 = vadd.f32 %v494_v25, %v489_v26 }
 0x157   : >> { %3662 = vmatmul.mubr.msk.f32.vlgmr.msra.gmra.mxu0 %vm468_vm0, %v496_v27 }
 0x217   : >> { %v572_v28 = vpop.f32.mrf.mxu0 }
 0x218   : >> { %583 = vrot.lane.b32.xlu0 %v572_v28, %s4038_s17  ;;  %577 = vrot.lane.b32.xlu1 %v572_v28, %s4039_s14  ;;  %s1122_s17 = scalar_lea.vmem [#allocation3], %s4232_s30 }
 0x219   : >> { %v3663_v29 = vpop.f32.mrf.mxu0 }
 0x21c   : >> { %580 = vrot.lane.b32.xlu1 %v572_v28, %s4040_s19 }
 0x220   : >> { %586 = vrot.lane.b32.xlu1 %v572_v28, %s4041_s22 }
 0x224   : >> { %589 = vrot.lane.b32.xlu1 %v572_v28, %s4042_s23 }
 0x228   : >> { %726 = vrot.lane.b32.xlu1 %v572_v28, %s4043_s24 }
 0x28a   : >> { %v584_v35 = vpop.permute.xlu0 %583  ;;  %v578_v36 = vpop.permute.xlu1 %577 }
 0x28b   : >> { %728 = vrot.lane.b32.xlu1 %v578_v36, %s4043_s24  ;;  %v608_v39 = vcombine.low %v578_v36, %v584_v35  ;;  %v609_v40 = vcombine.high %v578_v36, %v584_v35 }
 0x28d   : >> { %v616_v45 = vrot.slane %v608_v39, %v4268_v38  ;;  %v623_v46 = vrot.slane %v609_v40, %v4268_v38 }
 0x28e   : >> { %v581_v41 = vpop.permute.xlu1 %580 }
 0x28f   : >> { %v592_v42 = vcombine.low %v572_v28, %v581_v41  ;;  %v593_v43 = vcombine.high %v572_v28, %v581_v41  ;;  %730 = vrot.lane.b32.xlu1 %v581_v41, %s4043_s24 }
 0x291   : >> { %v600_v47 = vrot.slane %v592_v42, %v4268_v38  ;;  %v607_v48 = vrot.slane %v593_v43, %v4268_v38 }
 0x292   : >> { %v587_v49 = vpop.permute.xlu1 %586 }
 0x293   : >> { %v654_v50 = vcombine.low %v600_v47, %v616_v45  ;;  %v655_v51 = vcombine.high %v600_v47, %v616_v45  ;;  %v670_v52 = vcombine.low %v607_v48, %v623_v46  ;;  %v671_v53 = vcombine.high %v607_v48, %v623_v46  ;;  %732 = vrot.lane.b32.xlu1 %v584_v35, %s4043_s24 }
 0x294   : >> { %734 = vrot.lane.b32.xlu0 %v587_v49, %s4043_s24  ;;  %v624_v58 = vcombine.high %v587_v49, %v4036_v10  ;;  %v631_v2 = vrot.slane %v587_v49, %v4268_v38 }
 0x295   : >> { %v662_v54 = vrot.slane %v654_v50, %v4271_v44  ;;  %v669_v55 = vrot.slane %v655_v51, %v4271_v44  ;;  %v678_v56 = vrot.slane %v670_v52, %v4271_v44  ;;  %v685_v57 = vrot.slane %v671_v53, %v4271_v44 }
 0x296   : >> { %v590_v59 = vpop.permute.xlu1 %589  ;;  %v638_v9 = vrot.slane %v624_v58, %v4268_v38 }
 0x297   : >> { %v3535_v60 = vcombine.low %v662_v54, %v669_v55  ;;  %v3537_v61 = vcombine.high %v662_v54, %v669_v55  ;;  %v3539_v62 = vcombine.low %v678_v56, %v685_v57  ;;  %v3541_v63 = vcombine.high %v678_v56, %v685_v57  ;;  %736 = vrot.lane.b32.xlu1 %v590_v59, %s4043_s24 }
 0x298   : >> { %v639_v3 = vcombine.high %v590_v59, %v4036_v10  ;;  %v646_v4 = vrot.slane %v590_v59, %v4268_v38 }
 0x299   : >> { %v886_v5 = vrot.slane %v3535_v60, %v4268_v38  ;;  %v902_v6 = vrot.slane %v3537_v61, %v4268_v38  ;;  %v918_v7 = vrot.slane %v3539_v62, %v4268_v38  ;;  %v934_v8 = vrot.slane %v3541_v63, %v4268_v38 }
 0x29a   : >> { %v653_v11 = vrot.slane %v639_v3, %v4268_v38  ;;  %v686_v12 = vcombine.low %v631_v2, %v646_v4  ;;  %v687_v13 = vcombine.high %v631_v2, %v646_v4  ;;  %v727_v48 = vpop.permute.xlu1 %726 }
 0x29b   : >> { %v942_v14 = vcombine.low %v886_v5, %v902_v6  ;;  %v943_v15 = vcombine.high %v886_v5, %v902_v6  ;;  %v966_v16 = vcombine.low %v918_v7, %v934_v8  ;;  %v967_v17 = vcombine.high %v918_v7, %v934_v8 }
 0x29c   : >> { %v694_v18 = vrot.slane %v686_v12, %v4271_v44  ;;  %v701_v19 = vrot.slane %v687_v13, %v4271_v44  ;;  %v702_v20 = vcombine.low %v638_v9, %v653_v11  ;;  %v703_v21 = vcombine.high %v638_v9, %v653_v11 }
 0x29d   : >> { %v950_v22 = vrot.slane %v942_v14, %v4271_v44  ;;  %v957_v23 = vrot.slane %v943_v15, %v4271_v44  ;;  %v974_v24 = vrot.slane %v966_v16, %v4271_v44  ;;  %v981_v25 = vrot.slane %v967_v17, %v4271_v44 }
 0x29e   : >> { %v710_v26 = vrot.slane %v702_v20, %v4271_v44  ;;  %v717_v27 = vrot.slane %v703_v21, %v4271_v44  ;;  %v3536_v28 = vcombine.low %v694_v18, %v701_v19  ;;  %v3538_v29 = vcombine.high %v694_v18, %v701_v19 }
 0x29f   : >> { %v990_v30 = vcombine.low %v950_v22, %v974_v24  ;;  %v991_v31 = vcombine.high %v950_v22, %v974_v24  ;;  %v992_v32 = vcombine.low %v957_v23, %v981_v25  ;;  %v993_v33 = vcombine.high %v957_v23, %v981_v25 }
 0x2a0   : >> { %v893_v34 = vrot.slane %v3536_v28, %v4268_v38  ;;  %v909_v35 = vrot.slane %v3538_v29, %v4268_v38  ;;  %v3540_v36 = vcombine.low %v710_v26, %v717_v27  ;;  %v3542_v37 = vcombine.high %v710_v26, %v717_v27 }
 0x2a1   : >> { %998 = vst.msk [vmem:[%s996_s16] sm:$0xff] %vm997_vm2, %v990_v30  ;;  %999 = vst.msk [vmem:[%s996_s16 + $0x10] sm:$0xff] %vm997_vm2, %v991_v31 }
 0x2a2   : >> { %1000 = vst.msk [vmem:[%s996_s16 + $0x20] sm:$0xff] %vm997_vm2, %v992_v32  ;;  %1001 = vst.msk [vmem:[%s996_s16 + $0x30] sm:$0xff] %vm997_vm2, %v993_v33  ;;  %v925_v39 = vrot.slane %v3540_v36, %v4268_v38  ;;  %v941_v40 = vrot.slane %v3542_v37, %v4268_v38  ;;  %v958_v41 = vcombine.low %v893_v34, %v909_v35 }
 0x2a4   : >> { %v982_v42 = vcombine.low %v925_v39, %v941_v40  ;;  %v965_v43 = vrot.slane %v958_v41, %v4271_v44 }
 0x2a6   : >> { %v989_v45 = vrot.slane %v982_v42, %v4271_v44 }
 0x2a8   : >> { %v994_v46 = vcombine.low %v965_v43, %v989_v45  ;;  %v995_v47 = vcombine.high %v965_v43, %v989_v45 }
 0x2aa   : >> { %1002 = vst.msk [vmem:[%s996_s16 + $0x40] sm:$0xff] %vm997_vm2, %v994_v46  ;;  %1003 = vst.msk [vmem:[%s996_s16 + $0x50] sm:$0xff] %vm997_vm2, %v995_v47 }
 0x2fd   : >> { %v729_v49 = vpop.permute.xlu1 %728 }
 0x301   : >> { %v731_v50 = vpop.permute.xlu1 %730 }
 0x302   : >> { %v744_v51 = vcombine.low %v727_v48, %v731_v50  ;;  %v745_v52 = vcombine.high %v727_v48, %v731_v50 }
 0x304   : >> { %v752_v57 = vrot.slane %v744_v51, %v4268_v38  ;;  %v759_v58 = vrot.slane %v745_v52, %v4268_v38 }
 0x305   : >> { %v733_v53 = vpop.permute.xlu1 %732 }
 0x306   : >> { %v735_v54 = vpop.permute.xlu0 %734  ;;  %v760_v55 = vcombine.low %v729_v49, %v733_v53  ;;  %v761_v56 = vcombine.high %v729_v49, %v733_v53 }
 0x307   : >> { %v776_v61 = vcombine.high %v735_v54, %v4036_v10  ;;  %v783_v5 = vrot.slane %v735_v54, %v4268_v38 }
 0x308   : >> { %v768_v59 = vrot.slane %v760_v55, %v4268_v38  ;;  %v775_v60 = vrot.slane %v761_v56, %v4268_v38 }
 0x309   : >> { %v737_v62 = vpop.permute.xlu1 %736  ;;  %v790_v13 = vrot.slane %v776_v61, %v4268_v38 }
 0x30a   : >> { %v806_v63 = vcombine.low %v752_v57, %v768_v59  ;;  %v807_v2 = vcombine.high %v752_v57, %v768_v59  ;;  %v822_v3 = vcombine.low %v759_v58, %v775_v60  ;;  %v823_v4 = vcombine.high %v759_v58, %v775_v60 }
 0x30b   : >> { %v791_v6 = vcombine.high %v737_v62, %v4036_v10  ;;  %v798_v7 = vrot.slane %v737_v62, %v4268_v38 }
 0x30c   : >> { %v814_v8 = vrot.slane %v806_v63, %v4271_v44  ;;  %v821_v9 = vrot.slane %v807_v2, %v4271_v44  ;;  %v830_v11 = vrot.slane %v822_v3, %v4271_v44  ;;  %v837_v12 = vrot.slane %v823_v4, %v4271_v44 }
 0x30d   : >> { %v805_v14 = vrot.slane %v791_v6, %v4268_v38  ;;  %v838_v15 = vcombine.low %v783_v5, %v798_v7  ;;  %v839_v16 = vcombine.high %v783_v5, %v798_v7 }
 0x30e   : >> { %v3543_v17 = vcombine.low %v814_v8, %v821_v9  ;;  %v3545_v18 = vcombine.high %v814_v8, %v821_v9  ;;  %v3547_v19 = vcombine.low %v830_v11, %v837_v12  ;;  %v3549_v10 = vcombine.high %v830_v11, %v837_v12 }
 0x30f   : >> { %v846_v20 = vrot.slane %v838_v15, %v4271_v44  ;;  %v853_v21 = vrot.slane %v839_v16, %v4271_v44  ;;  %v854_v22 = vcombine.low %v790_v13, %v805_v14  ;;  %v855_v23 = vcombine.high %v790_v13, %v805_v14 }
 0x310   : >> { %v1012_v24 = vrot.slane %v3543_v17, %v4268_v38  ;;  %v1028_v25 = vrot.slane %v3545_v18, %v4268_v38  ;;  %v1044_v26 = vrot.slane %v3547_v19, %v4268_v38  ;;  %v1060_v27 = vrot.slane %v3549_v10, %v4268_v38 }
 0x311   : >> { %v862_v28 = vrot.slane %v854_v22, %v4271_v44  ;;  %v869_v29 = vrot.slane %v855_v23, %v4271_v44  ;;  %v3544_v30 = vcombine.low %v846_v20, %v853_v21  ;;  %v3546_v31 = vcombine.high %v846_v20, %v853_v21 }
 0x312   : >> { %v1068_v32 = vcombine.low %v1012_v24, %v1028_v25  ;;  %v1069_v33 = vcombine.high %v1012_v24, %v1028_v25  ;;  %v1092_v34 = vcombine.low %v1044_v26, %v1060_v27  ;;  %v1093_v35 = vcombine.high %v1044_v26, %v1060_v27 }
 0x313   : >> { %v1019_v36 = vrot.slane %v3544_v30, %v4268_v38  ;;  %v1035_v37 = vrot.slane %v3546_v31, %v4268_v38  ;;  %v3548_v39 = vcombine.low %v862_v28, %v869_v29  ;;  %v3550_v40 = vcombine.high %v862_v28, %v869_v29 }
 0x314   : >> { %v1076_v41 = vrot.slane %v1068_v32, %v4271_v44  ;;  %v1083_v42 = vrot.slane %v1069_v33, %v4271_v44  ;;  %v1100_v43 = vrot.slane %v1092_v34, %v4271_v44  ;;  %v1107_v45 = vrot.slane %v1093_v35, %v4271_v44 }
 0x315   : >> { %v1051_v46 = vrot.slane %v3548_v39, %v4268_v38  ;;  %v1067_v47 = vrot.slane %v3550_v40, %v4268_v38  ;;  %v1084_v48 = vcombine.low %v1019_v36, %v1035_v37 }
 0x316   : >> { %v1116_v49 = vcombine.low %v1076_v41, %v1100_v43  ;;  %v1117_v50 = vcombine.high %v1076_v41, %v1100_v43  ;;  %v1118_v51 = vcombine.low %v1083_v42, %v1107_v45  ;;  %v1119_v52 = vcombine.high %v1083_v42, %v1107_v45 }
 0x317   : >> { %v1108_v53 = vcombine.low %v1051_v46, %v1067_v47  ;;  %v1091_v54 = vrot.slane %v1084_v48, %v4271_v44 }
 0x318   : >> { %1123 = vst.msk [vmem:[%s1122_s17] sm:$0xff] %vm997_vm2, %v1116_v49  ;;  %1124 = vst.msk [vmem:[%s1122_s17 + $0x10] sm:$0xff] %vm997_vm2, %v1117_v50 }
 0x319   : >> { %1125 = vst.msk [vmem:[%s1122_s17 + $0x20] sm:$0xff] %vm997_vm2, %v1118_v51  ;;  %1126 = vst.msk [vmem:[%s1122_s17 + $0x30] sm:$0xff] %vm997_vm2, %v1119_v52  ;;  %v1115_v55 = vrot.slane %v1108_v53, %v4271_v44  ;;  %463 = sbr.rel (!%p461_p0) target bundleno = 32 (0x20), region = 131 }
 0x31b   : >> { %v1120_v38 = vcombine.low %v1091_v54, %v1115_v55  ;;  %v1121_v56 = vcombine.high %v1091_v54, %v1115_v55 }
 0x31d   : >> { %1127 = vst.msk [vmem:[%s1122_s17 + $0x40] sm:$0xff] %vm997_vm2, %v1120_v38  ;;  %1128 = vst.msk [vmem:[%s1122_s17 + $0x50] sm:$0xff] %vm997_vm2, %v1121_v56 }
 0x31e PF: > { %s3551_s30 = sshll.u32 %s4010_s28, 3  ;;  %vm1132_vm3 = vcmask 392192   ;;  %v1148_v57 = vlaneseq  ;;  %vm1509_vm4 = vcmask 7168   ;;  %vm1522_vm5 = vcmask 64512   ;;  %v1166_v5 = vld [vmem:[%s4941_s3 + $0x28] sm:$0xff]  ;;  %v1165_v8 = vld [vmem:[%s4941_s3 + $0x20] sm:$0xff] }
 0x31f   : > { %s1130_s14 = scalar_lea.vmem %s4222_s18, %s3551_s30  ;;  %v1531_v44 = vstv %s3551_s30  ;;  %v4046_v6 = vmov 0.0   ;;  %v4047_v7 = vmov -1e+30   ;;  %vm4048_vm6 = vmmov 0   ;;  %v1164_v9 = vld [vmem:[%s4941_s3 + $0x18] sm:$0xff]  ;;  %v1163_v11 = vld [vmem:[%s4941_s3 + $0x10] sm:$0xff] }
 0x320   : > { %v4359_v58 = vld [vmem:[%s1130_s14] sm:$0xff]  ;;  %v4362_v59 = vshrl.u32 %v1148_v57, 7  ;;  %3664 = vmatprep.subr.mxu0 %v4046_v6  ;;  %1510 = vst.msk [vmem:[#allocation4] sm:$0xff] %vm1509_vm4, %v4047_v7  ;;  %1511 = vst.msk [vmem:[#allocation4 + $0x8] sm:$0xff] %vm1509_vm4, %v4047_v7  ;;  %3676 = vmatprep.mubr.msk.f32.mxu0 %vm4048_vm6, %v4046_v6  ;;  %v1162_v12 = vld [vmem:[%s4941_s3 + $0x8] sm:$0xff]  ;;  %s4049_s19 = smov 104  }
 0x321   : > { %v1133_v60 = vsel %vm1132_vm3, %v4359_v58, 0.0  ;;  %1512 = vst.msk [vmem:[#allocation4 + $0x10] sm:$0xff] %vm1509_vm4, %v4047_v7  ;;  %1513 = vst.msk [vmem:[#allocation4 + $0x18] sm:$0xff] %vm1509_vm4, %v4047_v7  ;;  %3665 = vmatpush3.msra.mxu0 %v1166_v5  ;;  %v1161_v13 = vld [vmem:[%s4941_s3] sm:$0xff]  ;;  %s4050_s22 = smov 120   ;;  %s4051_s23 = smov 112  }
 0x322   : > { %v4367_v61 = vadd.s32 %v1531_v44, %v4362_v59  ;;  %1134 = vadd.xlane.f32.xlu0 %v1133_v60  ;;  %1514 = vst.msk [vmem:[#allocation4 + $0x20] sm:$0xff] %vm1509_vm4, %v4047_v7  ;;  %1515 = vst.msk [vmem:[#allocation4 + $0x28] sm:$0xff] %vm1509_vm4, %v4047_v7  ;;  %3666 = vmatprep.subr.mxu0 %v4046_v6  ;;  %v4428_v17 = vsub.s32 0, %v4362_v59  ;;  %s4052_s24 = smov 96   ;;  %s4053_s16 = smov 88  }
 0x323   : > { %1516 = vst.msk [vmem:[#allocation5] sm:$0xff] %vm1509_vm4, %v4046_v6  ;;  %1517 = vst.msk [vmem:[#allocation5 + $0x8] sm:$0xff] %vm1509_vm4, %v4046_v6  ;;  %3667 = vmatpush3.msra.mxu0 %v1165_v8  ;;  %s1533_s17 = sadd.s32 1, %s4010_s28  ;;  %v4055_v26 = vmov 1934713408  }
 0x324   : > { %1518 = vst.msk [vmem:[#allocation5 + $0x10] sm:$0xff] %vm1509_vm4, %v4046_v6  ;;  %1519 = vst.msk [vmem:[#allocation5 + $0x18] sm:$0xff] %vm1509_vm4, %v4046_v6  ;;  %3668 = vmatprep.subr.mxu0 %v4046_v6  ;;  %v1151_v18 = vrot.slane %v4207_v0, %v4428_v17  ;;  %v1158_v20 = vrot.slane %v4212_v1, %v4428_v17  ;;  %v4054_v0 = vmov 1983009808   ;;  %v1322_v27 = vunpack.c.l.s4 %v4055_v26  ;;  %p3561_p1 = scmp.le.s32.totalorder %s1533_s17, 0 }
 0x325   : > { %1520 = vst.msk [vmem:[#allocation5 + $0x20] sm:$0xff] %vm1509_vm4, %v4046_v6  ;;  %1521 = vst.msk [vmem:[#allocation5 + $0x28] sm:$0xff] %vm1509_vm4, %v4046_v6  ;;  %3669 = vmatpush3.msra.mxu0 %v1164_v9  ;;  %v1260_v1 = vunpack.c.l.s4 %v4054_v0  ;;  %s4466_s30 = smov (!%p3561_p1), 0  }
 0x326   : > { %1523 = vst.msk [vmem:[#allocation6] sm:$0xff] %vm1522_vm5, %v4046_v6  ;;  %1524 = vst.msk [vmem:[#allocation6 + $0x8] sm:$0xff] %vm1522_vm5, %v4046_v6  ;;  %3670 = vmatprep.subr.mxu0 %v4046_v6  ;;  %v1323_v31 = vunpack.c.0.s8 %v1322_v27 }
 0x327   : > { %1525 = vst.msk [vmem:[#allocation6 + $0x10] sm:$0xff] %vm1522_vm5, %v4046_v6  ;;  %1526 = vst.msk [vmem:[#allocation6 + $0x18] sm:$0xff] %vm1522_vm5, %v4046_v6  ;;  %3671 = vmatpush3.msra.mxu0 %v1163_v11  ;;  %v1261_v28 = vunpack.c.0.s8 %v1260_v1 }
 0x328   : > { %1527 = vst.msk [vmem:[#allocation6 + $0x20] sm:$0xff] %vm1522_vm5, %v4046_v6  ;;  %1528 = vst.msk [vmem:[#allocation6 + $0x28] sm:$0xff] %vm1522_vm5, %v4046_v6  ;;  %3672 = vmatprep.subr.mxu0 %v4046_v6  ;;  %v1326_v39 = vsub.s32 %v1323_v31, %v4362_v59 }
 0x329   : > { %3673 = vmatpush3.msra.mxu0 %v1162_v12  ;;  %v1264_v32 = vsub.s32 %v1261_v28, %v4362_v59 }
 0x32a   : > { %3674 = vmatprep.subr.mxu0 %v4046_v6 }
 0x32b   : > { %3675 = vmatpush3.msra.mxu0 %v1161_v13 }
 0x3ab   : > { %v1135_v62 = vpop.xlane.xlu0 %1134 }
 0x3ac   : > { %v1137_v63 = vmul.f32 0.020833334, %v1135_v62 }
 0x3ae   : > { %v1138_v2 = vsub.f32 %v4359_v58, %v1137_v63 }
 0x3b0   : > { %v1139_v3 = vmul.f32 %v1138_v2, %v1138_v2 }
 0x3b2   : > { %v1140_v4 = vsel %vm1132_vm3, %v1139_v3, 0.0 }
 0x3b3   : > { %1141 = vadd.xlane.f32.xlu0 %v1140_v4 }
 0x43c   : > { %v1142_v14 = vpop.xlane.xlu0 %1141 }
 0x43d   : > { %v1143_v15 = vmul.f32 0.020833334, %v1142_v14 }
 0x43f   : > { %v1144_v16 = vadd.f32 1e-05, %v1143_v15 }
 0x441   : > { %3882 = vrsqrt.f32 %v1144_v16 }
 0x44e   : > { %v3883_v19 = vpop.eup %3882 }
 0x44f   : > { %v1146_v10 = vmul.f32 %v3883_v19, %v1138_v2 }
 0x451   : > { %v1153_v21 = vmul.f32 %v1151_v18, %v1146_v10 }
 0x453   : > { %v1160_v22 = vadd.f32 %v1158_v20, %v1153_v21 }
 0x455   : > { %3677 = vmatmul.mubr.msk.f32.vlgmr.msra.gmra.mxu0 %vm1132_vm3, %v1160_v22 }
 0x515   : > { %v1236_v23 = vpop.f32.mrf.mxu0 }
 0x516   : > { %v1240_v24 = vmul.f32 0.14433756, %v1236_v23 }
 0x517   : > { %v3678_v25 = vpop.f32.mrf.mxu0 }
 0x518   : > { %1248 = vrot.lane.b32.xlu0 %v1240_v24, %s4049_s19  ;;  %1242 = vrot.lane.b32.xlu1 %v1240_v24, %s4050_s22 }
 0x51c   : > { %1245 = vrot.lane.b32.xlu1 %v1240_v24, %s4051_s23 }
 0x520   : > { %1251 = vrot.lane.b32.xlu1 %v1240_v24, %s4052_s24 }
 0x524   : > { %1254 = vrot.lane.b32.xlu1 %v1240_v24, %s4053_s16 }
 0x58a   : > { %v1249_v29 = vpop.permute.xlu0 %1248  ;;  %v1243_v30 = vpop.permute.xlu1 %1242 }
 0x58b   : > { %v1273_v33 = vcombine.low %v1243_v30, %v1249_v29  ;;  %v1274_v34 = vcombine.high %v1243_v30, %v1249_v29 }
 0x58d   : > { %v1281_v40 = vrot.slane %v1273_v33, %v1264_v32  ;;  %v1288_v41 = vrot.slane %v1274_v34, %v1264_v32 }
 0x58e   : > { %v1246_v35 = vpop.permute.xlu1 %1245 }
 0x58f   : > { %v1257_v36 = vcombine.low %v1240_v24, %v1246_v35  ;;  %v1258_v37 = vcombine.high %v1240_v24, %v1246_v35 }
 0x591   : > { %v1265_v42 = vrot.slane %v1257_v36, %v1264_v32  ;;  %v1272_v43 = vrot.slane %v1258_v37, %v1264_v32 }
 0x592   : > { %v1252_v45 = vpop.permute.xlu1 %1251 }
 0x593   : > { %v1319_v46 = vcombine.low %v1265_v42, %v1281_v40  ;;  %v1320_v47 = vcombine.high %v1265_v42, %v1281_v40  ;;  %v1335_v48 = vcombine.low %v1272_v43, %v1288_v41  ;;  %v1336_v49 = vcombine.high %v1272_v43, %v1288_v41 }
 0x594   : > { %v1289_v54 = vcombine.high %v1252_v45, %v4046_v6  ;;  %v1296_v62 = vrot.slane %v1252_v45, %v1264_v32 }
 0x595   : > { %v1327_v50 = vrot.slane %v1319_v46, %v1326_v39  ;;  %v1334_v51 = vrot.slane %v1320_v47, %v1326_v39  ;;  %v1343_v52 = vrot.slane %v1335_v48, %v1326_v39  ;;  %v1350_v53 = vrot.slane %v1336_v49, %v1326_v39 }
 0x596   : > { %v1255_v55 = vpop.permute.xlu1 %1254  ;;  %v1303_v8 = vrot.slane %v1289_v54, %v1264_v32 }
 0x597   : > { %v3553_v38 = vcombine.low %v1327_v50, %v1334_v51  ;;  %v3555_v56 = vcombine.high %v1327_v50, %v1334_v51  ;;  %v3557_v44 = vcombine.low %v1343_v52, %v1350_v53  ;;  %v3559_v60 = vcombine.high %v1343_v52, %v1350_v53 }
 0x598   : > { %v1304_v63 = vcombine.high %v1255_v55, %v4046_v6  ;;  %v1311_v2 = vrot.slane %v1255_v55, %v1264_v32 }
 0x599   : > { %v1399_v3 = vrot.slane %v3553_v38, %v1264_v32  ;;  %v1415_v4 = vrot.slane %v3555_v56, %v1264_v32  ;;  %v1431_v5 = vrot.slane %v3557_v44, %v1264_v32  ;;  %v1447_v7 = vrot.slane %v3559_v60, %v1264_v32 }
 0x59a   : > { %v1318_v9 = vrot.slane %v1304_v63, %v1264_v32  ;;  %v1351_v11 = vcombine.low %v1296_v62, %v1311_v2  ;;  %v1352_v12 = vcombine.high %v1296_v62, %v1311_v2 }
 0x59b   : > { %v1455_v13 = vcombine.low %v1399_v3, %v1415_v4  ;;  %v1456_v14 = vcombine.high %v1399_v3, %v1415_v4  ;;  %v1479_v15 = vcombine.low %v1431_v5, %v1447_v7  ;;  %v1480_v16 = vcombine.high %v1431_v5, %v1447_v7 }
 0x59c   : > { %v1359_v18 = vrot.slane %v1351_v11, %v1326_v39  ;;  %v1366_v19 = vrot.slane %v1352_v12, %v1326_v39  ;;  %v1367_v10 = vcombine.low %v1303_v8, %v1318_v9  ;;  %v1368_v20 = vcombine.high %v1303_v8, %v1318_v9 }
 0x59d   : > { %v4440_v21 = vrot.slane %v1455_v13, %v1326_v39  ;;  %v4442_v22 = vrot.slane %v1456_v14, %v1326_v39  ;;  %v4444_v23 = vrot.slane %v1479_v15, %v1326_v39  ;;  %v4446_v24 = vrot.slane %v1480_v16, %v1326_v39 }
 0x59e   : > { %v1375_v25 = vrot.slane %v1367_v10, %v1326_v39  ;;  %v1382_v0 = vrot.slane %v1368_v20, %v1326_v39  ;;  %v3554_v1 = vcombine.low %v1359_v18, %v1366_v19  ;;  %v3556_v26 = vcombine.high %v1359_v18, %v1366_v19 }
 0x59f   : > { %v1503_v27 = vcombine.low %v4440_v21, %v4444_v23  ;;  %v1504_v28 = vcombine.high %v4440_v21, %v4444_v23  ;;  %v1505_v29 = vcombine.low %v4442_v22, %v4446_v24  ;;  %v1506_v30 = vcombine.high %v4442_v22, %v4446_v24 }
 0x5a0   : > { %v1406_v31 = vrot.slane %v3554_v1, %v1264_v32  ;;  %v1422_v33 = vrot.slane %v3556_v26, %v1264_v32  ;;  %v3558_v34 = vcombine.low %v1375_v25, %v1382_v0  ;;  %v3560_v35 = vcombine.high %v1375_v25, %v1382_v0 }
 0x5a2   : > { %v1438_v36 = vrot.slane %v3558_v34, %v1264_v32  ;;  %v1454_v37 = vrot.slane %v3560_v35, %v1264_v32  ;;  %v1471_v40 = vcombine.low %v1406_v31, %v1422_v33 }
 0x5a4   : > { %v1495_v41 = vcombine.low %v1438_v36, %v1454_v37  ;;  %v4456_v42 = vrot.slane %v1471_v40, %v1326_v39  ;;  %3489 = sbr.rel (%p3561_p1) target bundleno = 2148 (0x864), region = 136 }
 0x5a6   : > { %v4458_v43 = vrot.slane %v1495_v41, %v1326_v39 }
 0x5a8   : > { %v1507_v45 = vcombine.low %v4456_v42, %v4458_v43  ;;  %v1508_v46 = vcombine.high %v4456_v42, %v4458_v43 }
 0x5a9 LB: >> { %v4056_v32 = vmov 0.0   ;;  %s4474_s14 = sshll.u32 %s4034_s30, 3  ;;  %vm4057_vm7 = vmmov 0   ;;  %v2012_v52 = vand.u32 127, %v1148_v57  ;;  %v4058_v0 = vmov 0   ;;  %v2024_v1 = vld [vmem:[#allocation4] sm:$0xff]  ;;  %s4034_s30 = sphi %s4466_s30, %s1537_s30  }
 0x5aa   : >> { %3679 = vmatprep.subr.mxu0 %v4056_v32  ;;  %3684 = vmatprep.subr.mxu1 %v4056_v32  ;;  %s1541_s18 = scalar_lea.vmem [#allocation2], %s4474_s14  ;;  %v2013_v53 = vstv %s4474_s14  ;;  %v2025_v33 = vld [vmem:[#allocation4 + $0x8] sm:$0xff]  ;;  %v2026_v34 = vld [vmem:[#allocation4 + $0x10] sm:$0xff]  ;;  %s4595_s25 = scalar_lea.vmem [#allocation3], %s4474_s14 }
 0x5ab   : >> { %3681 = vmatprep.mubr.msk.f32.mxu0 %vm4057_vm7, %v4056_v32  ;;  %3686 = vmatprep.mubr.msk.f32.mxu1 %vm4057_vm7, %v4056_v32  ;;  %v1542_v39 = vld [vmem:[%s1541_s18] sm:$0xff]  ;;  %v1543_v47 = vld [vmem:[%s1541_s18 + $0x10] sm:$0xff]  ;;  %v2014_v54 = vadd.s32 %v2013_v53, %v2012_v52  ;;  %s1537_s30 = sadd.s32 1, %s4034_s30  }
 0x5ac   : >> { %3680 = vmatpush3.xpose.msk.msra.mxu0 %vm1522_vm5, %v1542_v39  ;;  %3685 = vmatpush3.xpose.msk.msra.mxu1 %vm1522_vm5, %v1543_v47  ;;  %v1544_v48 = vld [vmem:[%s1541_s18 + $0x20] sm:$0xff]  ;;  %v1545_v49 = vld [vmem:[%s1541_s18 + $0x30] sm:$0xff]  ;;  %v2027_v47 = vld [vmem:[#allocation4 + $0x18] sm:$0xff]  ;;  %p1536_p2 = scmp.ge.s32.totalorder %s1537_s30, %s1533_s17 }
 0x5ad   : >> { %3689 = vmatprep.subr.mxu0 %v4056_v32  ;;  %3694 = vmatprep.subr.mxu1 %v4056_v32  ;;  %v1546_v50 = vld [vmem:[%s1541_s18 + $0x40] sm:$0xff]  ;;  %v1547_v51 = vld [vmem:[%s1541_s18 + $0x50] sm:$0xff]  ;;  %vm4532_vm8 = vcmp.le.s32.totalorder %v2014_v54, %v4367_v61 }
 0x5ae   : >> { %3884 = vset.pattern.permute.xlu0 %v4058_v0  ;;  %3885 = vset.pattern.permute.xlu1 %v4058_v0 }
 0x5af   : >> { %3682 = vmatmul.mubr.msk.f32.vlgmr.msra.gmra.mxu0 %vm1522_vm5, %v1503_v27  ;;  %3687 = vmatmul.mubr.msk.f32.vlgmr.msra.gmra.mxu1 %vm1522_vm5, %v1504_v28 }
 0x5b0   : >> { %3690 = vmatpush3.xpose.msk.msra.mxu0 %vm1522_vm5, %v1544_v48  ;;  %3691 = vmatprep.mubr.msk.f32.mxu0 %vm4057_vm7, %v4056_v32  ;;  %v4573_v48 = vld [vmem:[#allocation4 + $0x20] sm:$0xff] }
 0x5b1   : >> { %3695 = vmatpush3.xpose.msk.msra.mxu1 %vm1522_vm5, %v1545_v49  ;;  %3696 = vmatprep.mubr.msk.f32.mxu1 %vm4057_vm7, %v4056_v32 }
 0x5b2   : >> { %3699 = vmatprep.subr.mxu0 %v4056_v32  ;;  %3704 = vmatprep.subr.mxu1 %v4056_v32 }
 0x5b3   : >> { %3692 = vmatmul.mubr.msk.f32.vlgmr.msra.gmra.mxu0 %vm1522_vm5, %v1505_v29 }
 0x5b4   : >> { %3697 = vmatmul.mubr.msk.f32.vlgmr.msra.gmra.mxu1 %vm1522_vm5, %v1506_v30  ;;  %3700 = vmatpush3.xpose.msk.msra.mxu0 %vm1522_vm5, %v1546_v50 }
 0x5b5   : >> { %3701 = vmatprep.mubr.msk.f32.mxu0 %vm4057_vm7, %v4056_v32  ;;  %3705 = vmatpush3.xpose.msk.msra.mxu1 %vm1522_vm5, %v1547_v51 }
 0x5b6   : >> { %3706 = vmatprep.mubr.msk.f32.mxu1 %vm4057_vm7, %v4056_v32  ;;  %3709 = vmatprep.subr.mxu0 %v4056_v32 }
 0x5b7   : >> { %3702 = vmatmul.mubr.msk.f32.vlgmr.msra.gmra.mxu0 %vm1522_vm5, %v1507_v45  ;;  %3714 = vmatprep.subr.mxu1 %v4056_v32 }
 0x5b8   : >> { %3707 = vmatmul.mubr.msk.f32.vlgmr.msra.gmra.mxu1 %vm1522_vm5, %v1508_v46  ;;  %3711 = vmatprep.mubr.msk.f32.mxu0 %vm4057_vm7, %v4056_v32 }
 0x5b9   : >> { %3716 = vmatprep.mubr.msk.f32.mxu1 %vm4057_vm7, %v4056_v32 }
 0x66f   : >> { %v1627_v38 = vpop.f32.mrf.mxu0  ;;  %v1703_v56 = vpop.f32.mrf.mxu1 }
 0x670   : >> { %v4538_v44 = vsel %vm4532_vm8, %v1627_v38, -1e+30  ;;  %v4542_v60 = vsel %vm4532_vm8, %v1703_v56, -1e+30  ;;  %v4580_v38 = vld [vmem:[#allocation4 + $0x28] sm:$0xff] }
 0x671   : >> { %v3683_v62 = vpop.f32.mrf.mxu0  ;;  %v2030_v63 = vsel %vm1522_vm5, %v4538_v44, -inf  ;;  %v3688_v2 = vpop.f32.mrf.mxu1  ;;  %v2033_v4 = vsel %vm1522_vm5, %v4542_v60, -inf }
 0x672   : >> { %2031 = vmax.xlane.f32.xlu0 %v2030_v63 }
 0x673   : >> { %v1779_v3 = vpop.f32.mrf.mxu0 }
 0x674   : >> { %v4550_v5 = vsel %vm4532_vm8, %v1779_v3, -1e+30  ;;  %v1855_v7 = vpop.f32.mrf.mxu1 }
 0x675   : >> { %v2036_v8 = vsel %vm1522_vm5, %v4550_v5, -inf  ;;  %v3693_v9 = vpop.f32.mrf.mxu0  ;;  %v4556_v11 = vsel %vm4532_vm8, %v1855_v7, -1e+30 }
 0x676   : >> { %2034 = vmax.xlane.f32.xlu0 %v2033_v4  ;;  %2037 = vmax.xlane.f32.xlu1 %v2036_v8  ;;  %v3698_v12 = vpop.f32.mrf.mxu1  ;;  %v2039_v13 = vsel %vm1522_vm5, %v4556_v11, -inf  ;;  %v1549_v8 = vld [vmem:[%s4595_s25] sm:$0xff]  ;;  %v1550_v9 = vld [vmem:[%s4595_s25 + $0x10] sm:$0xff] }
 0x677   : >> { %v1931_v14 = vpop.f32.mrf.mxu0  ;;  %3710 = vmatpush3.msra.mxu0 %v1549_v8  ;;  %3715 = vmatpush3.msra.mxu1 %v1550_v9 }
 0x678   : >> { %v4562_v15 = vsel %vm4532_vm8, %v1931_v14, -1e+30  ;;  %v2007_v16 = vpop.f32.mrf.mxu1  ;;  %3719 = vmatprep.subr.mxu0 %v4056_v32  ;;  %3724 = vmatprep.subr.mxu1 %v4056_v32 }
 0x679   : >> { %v3703_v18 = vpop.f32.mrf.mxu0  ;;  %v4566_v19 = vsel %vm4532_vm8, %v2007_v16, -1e+30  ;;  %v2042_v10 = vsel %vm1522_vm5, %v4562_v15, -inf }
 0x67a   : >> { %2040 = vmax.xlane.f32.xlu1 %v2039_v13  ;;  %2043 = vmax.xlane.f32.xlu0 %v2042_v10  ;;  %v3708_v20 = vpop.f32.mrf.mxu1  ;;  %v2045_v25 = vsel %vm1522_vm5, %v4566_v19, -inf }
 0x67e   : >> { %2046 = vmax.xlane.f32.xlu1 %v2045_v25 }
 0x6fb   : >> { %v2032_v26 = vpop.xlane.xlu0 %2031 }
 0x6fc   : >> { %v2048_v31 = vmax.f32 %v2024_v1, %v2032_v26 }
 0x6fe   : >> { %v2054_v35 = vsub.f32 %v2024_v1, %v2048_v31  ;;  %2654 = vst.msk [vmem:[#allocation4] sm:$0xff] %vm1509_vm4, %v2048_v31  ;;  %2074 = vperm.xlu0 %3884, %v2048_v31  }
 0x6ff   : >> { %v2035_v36 = vpop.xlane.xlu0 %2034  ;;  %v2038_v37 = vpop.xlane.xlu1 %2037 }
 0x700   : >> { %v2060_v40 = vmul.f32 1.442695, %v2054_v35  ;;  %v2049_v41 = vmax.f32 %v2025_v33, %v2035_v36  ;;  %v2050_v39 = vmax.f32 %v2026_v34, %v2038_v37 }
 0x702   : >> { %3886 = vpow2.f32 %v2060_v40  ;;  %v2055_v49 = vsub.f32 %v2025_v33, %v2049_v41  ;;  %2655 = vst.msk [vmem:[#allocation4 + $0x8] sm:$0xff] %vm1509_vm4, %v2049_v41  ;;  %2656 = vst.msk [vmem:[#allocation4 + $0x10] sm:$0xff] %vm1509_vm4, %v2050_v39  ;;  %2079 = vperm.xlu1 %3885, %v2049_v41   ;;  %v2056_v53 = vsub.f32 %v2026_v34, %v2050_v39  ;;  %v1551_v40 = vld [vmem:[%s4595_s25 + $0x20] sm:$0xff] }
 0x703   : >> { %v2041_v50 = vpop.xlane.xlu1 %2040  ;;  %v2044_v51 = vpop.xlane.xlu0 %2043 }
 0x704   : >> { %v2062_v52 = vmul.f32 1.442695, %v2055_v49  ;;  %v2051_v54 = vmax.f32 %v2027_v47, %v2041_v50  ;;  %v4578_v55 = vmax.f32 %v4573_v48, %v2044_v51  ;;  %v2064_v2 = vmul.f32 1.442695, %v2056_v53  ;;  %v1554_v53 = vld [vmem:[%s4595_s25 + $0x50] sm:$0xff] }
 0x706   : >> { %v2057_v56 = vsub.f32 %v2027_v47, %v2051_v54  ;;  %2657 = vst.msk [vmem:[#allocation4 + $0x18] sm:$0xff] %vm1509_vm4, %v2051_v54  ;;  %2084 = vperm.xlu1 %3885, %v2050_v39   ;;  %v2058_v62 = vsub.f32 %v4573_v48, %v4578_v55  ;;  %2658 = vst.msk [vmem:[#allocation4 + $0x20] sm:$0xff] %vm1509_vm4, %v4578_v55  ;;  %3888 = vpow2.f32 %v2062_v52  ;;  %v2120_v48 = vld [vmem:[#allocation5] sm:$0xff] }
 0x707   : >> { %v2047_v63 = vpop.xlane.xlu1 %2046 }
 0x708   : >> { %v2066_v3 = vmul.f32 1.442695, %v2057_v56  ;;  %v4588_v4 = vmax.f32 %v4580_v38, %v2047_v63  ;;  %v2068_v8 = vmul.f32 1.442695, %v2058_v62 }
 0x70a   : >> { %3890 = vpow2.f32 %v2066_v3  ;;  %2089 = vperm.xlu1 %3885, %v2051_v54   ;;  %v2059_v7 = vsub.f32 %v4580_v38, %v4588_v4  ;;  %2659 = vst.msk [vmem:[#allocation4 + $0x28] sm:$0xff] %vm1509_vm4, %v4588_v4 }
 0x70b   : >> { %3892 = vpow2.f32 %v2064_v2 }
 0x70e   : >> { %2094 = vperm.xlu1 %3885, %v4578_v55  }
 0x70f   : >> { %v4601_v12 = vpop.eup %3886 }
 0x710   : >> { %2170 = vperm.xlu0 %3884, %v4601_v12   ;;  %v2126_v55 = vmul.f32 %v4601_v12, %v2120_v48 }
 0x712   : >> { %2099 = vperm.xlu1 %3885, %v4588_v4  }
 0x713   : >> { %v4606_v13 = vpop.eup %3888 }
 0x716   : >> { %2175 = vperm.xlu1 %3885, %v4606_v13  }
 0x717   : >> { %v4609_v14 = vpop.eup %3890 }
 0x718   : >> { %2185 = vperm.xlu0 %3884, %v4609_v14   ;;  %v4612_v16 = vpop.eup %3892 }
 0x71a   : >> { %2180 = vperm.xlu1 %3885, %v4612_v16  }
 0x779   : >> { %v2075_v18 = vpop.permute.xlu0 %2074 }
 0x77a   : >> { %v2102_v10 = vsub.f32 %v4538_v44, %v2075_v18  ;;  %v2070_v18 = vmul.f32 1.442695, %v2059_v7  ;;  %v2122_v7 = vld [vmem:[#allocation5 + $0x10] sm:$0xff] }
 0x77c   : >> { %v2108_v20 = vmul.f32 1.442695, %v2102_v10 }
 0x77d   : >> { %v2080_v25 = vpop.permute.xlu1 %2079 }
 0x77e   : >> { %3894 = vpow2.f32 %v2108_v20  ;;  %v2103_v0 = vsub.f32 %v4542_v60, %v2080_v25 }
 0x780   : >> { %v2110_v1 = vmul.f32 1.442695, %v2103_v0 }
 0x781   : >> { %v2085_v26 = vpop.permute.xlu1 %2084 }
 0x782   : >> { %3896 = vpow2.f32 %v2110_v1  ;;  %v2104_v31 = vsub.f32 %v4550_v5, %v2085_v26  ;;  %v2121_v26 = vld [vmem:[#allocation5 + $0x8] sm:$0xff] }
 0x783   : >> { %v2127_v38 = vmul.f32 %v4606_v13, %v2121_v26  ;;  %v2167_v26 = vld [vmem:[#allocation6 + $0x28] sm:$0xff] }
 0x784   : >> { %v2112_v33 = vmul.f32 1.442695, %v2104_v31 }
 0x785   : >> { %v2090_v34 = vpop.permute.xlu1 %2089 }
 0x786   : >> { %3898 = vpow2.f32 %v2112_v33  ;;  %v2105_v35 = vsub.f32 %v4556_v11, %v2090_v34  ;;  %v1552_v11 = vld [vmem:[%s4595_s25 + $0x30] sm:$0xff]  ;;  %v2128_v34 = vmul.f32 %v4612_v16, %v2122_v7 }
 0x788   : >> { %v2114_v36 = vmul.f32 1.442695, %v2105_v35 }
 0x789   : >> { %v2095_v37 = vpop.permute.xlu1 %2094 }
 0x78a   : >> { %3900 = vpow2.f32 %v2114_v36  ;;  %v2106_v44 = vsub.f32 %v4562_v15, %v2095_v37  ;;  %v2123_v36 = vld [vmem:[#allocation5 + $0x18] sm:$0xff] }
 0x78b   : >> { %v3895_v41 = vpop.eup %3894  ;;  %v2171_v25 = vpop.permute.xlu0 %2170  ;;  %v2129_v12 = vmul.f32 %v4609_v14, %v2123_v36 }
 0x78c   : >> { %v2116_v39 = vmul.f32 1.442695, %v2106_v44  ;;  %3712 = vmatmul.mubr.msk.f32.vlgmr.msra.gmra.mxu0 %vm1522_vm5, %v3895_v41  ;;  %v2132_v60 = vsel %vm1522_vm5, %v3895_v41, 0.0 }
 0x78d   : >> { %v2100_v47 = vpop.permute.xlu1 %2099  ;;  %2133 = vadd.xlane.f32.xlu1 %v2132_v60  ;;  %3720 = vmatpush3.msra.mxu0 %v1551_v40  ;;  %v2124_v40 = vld [vmem:[#allocation5 + $0x20] sm:$0xff]  ;;  %v2125_v60 = vld [vmem:[#allocation5 + $0x28] sm:$0xff] }
 0x78e   : >> { %3902 = vpow2.f32 %v2116_v39  ;;  %v2107_v5 = vsub.f32 %v4566_v19, %v2100_v47  ;;  %3721 = vmatprep.mubr.msk.f32.mxu0 %vm4057_vm7, %v4056_v32  ;;  %3729 = vmatprep.subr.mxu0 %v4056_v32  ;;  %v1553_v19 = vld [vmem:[%s4595_s25 + $0x40] sm:$0xff] }
 0x78f   : >> { %v3897_v15 = vpop.eup %3896 }
 0x790   : >> { %v2118_v49 = vmul.f32 1.442695, %v2107_v5  ;;  %3717 = vmatmul.mubr.msk.f32.vlgmr.msra.gmra.mxu1 %vm1522_vm5, %v3897_v15  ;;  %v2135_v50 = vsel %vm1522_vm5, %v3897_v15, 0.0  ;;  %v2162_v15 = vld [vmem:[#allocation6] sm:$0xff] }
 0x791   : >> { %2136 = vadd.xlane.f32.xlu0 %v2135_v50  ;;  %3725 = vmatpush3.msra.mxu1 %v1552_v11  ;;  %v2176_v20 = vpop.permute.xlu1 %2175  ;;  %v2163_v50 = vld [vmem:[#allocation6 + $0x8] sm:$0xff] }
 0x792   : >> { %3904 = vpow2.f32 %v2118_v49  ;;  %3726 = vmatprep.mubr.msk.f32.mxu1 %vm4057_vm7, %v4056_v32  ;;  %3734 = vmatprep.subr.mxu1 %v4056_v32  ;;  %v2198_v49 = vmul.f32 %v2171_v25, %v2162_v15 }
 0x793   : >> { %v3899_v51 = vpop.eup %3898  ;;  %3906 = vpow2.f32 %v2068_v8  ;;  %v2186_v62 = vpop.permute.xlu0 %2185 }
 0x794   : >> { %3722 = vmatmul.mubr.msk.f32.vlgmr.msra.gmra.mxu0 %vm1522_vm5, %v3899_v51  ;;  %v2138_v52 = vsel %vm1522_vm5, %v3899_v51, 0.0  ;;  %3908 = vpow2.f32 %v2070_v18 }
 0x795   : >> { %2139 = vadd.xlane.f32.xlu1 %v2138_v52  ;;  %3730 = vmatpush3.msra.mxu0 %v1553_v19  ;;  %v2181_v0 = vpop.permute.xlu1 %2180  ;;  %v2199_v52 = vmul.f32 %v2176_v20, %v2163_v50 }
 0x796   : >> { %3731 = vmatprep.mubr.msk.f32.mxu0 %vm4057_vm7, %v4056_v32 }
 0x797   : >> { %v3901_v54 = vpop.eup %3900 }
 0x798   : >> { %3727 = vmatmul.mubr.msk.f32.vlgmr.msra.gmra.mxu1 %vm1522_vm5, %v3901_v54  ;;  %v2141_v56 = vsel %vm1522_vm5, %v3901_v54, 0.0 }
 0x799   : >> { %2142 = vadd.xlane.f32.xlu1 %v2141_v56  ;;  %3735 = vmatpush3.msra.mxu1 %v1554_v53  ;;  %v2164_v53 = vld [vmem:[#allocation6 + $0x10] sm:$0xff] }
 0x79a   : >> { %3736 = vmatprep.mubr.msk.f32.mxu1 %vm4057_vm7, %v4056_v32 }
 0x79b   : >> { %v3903_v63 = vpop.eup %3902 }
 0x79c   : >> { %3732 = vmatmul.mubr.msk.f32.vlgmr.msra.gmra.mxu0 %vm1522_vm5, %v3903_v63  ;;  %v2144_v2 = vsel %vm1522_vm5, %v3903_v63, 0.0 }
 0x79d   : >> { %2145 = vadd.xlane.f32.xlu0 %v2144_v2  ;;  %v2200_v2 = vmul.f32 %v2181_v0, %v2164_v53 }
 0x79f   : >> { %v3905_v3 = vpop.eup %3904 }
 0x7a0   : >> { %3737 = vmatmul.mubr.msk.f32.vlgmr.msra.gmra.mxu1 %vm1522_vm5, %v3905_v3  ;;  %v2147_v9 = vsel %vm1522_vm5, %v3905_v3, 0.0  ;;  %v3907_v32 = vpop.eup %3906  ;;  %v2165_v3 = vld [vmem:[#allocation6 + $0x18] sm:$0xff] }
 0x7a1   : >> { %2148 = vadd.xlane.f32.xlu1 %v2147_v9  ;;  %v3909_v10 = vpop.eup %3908  ;;  %v2130_v13 = vmul.f32 %v3907_v32, %v2124_v40 }
 0x7a2   : >> { %v2131_v5 = vmul.f32 %v3909_v10, %v2125_v60 }
 0x7b2   : >> { %2190 = vperm.xlu1 %3885, %v3907_v32   ;;  %v2201_v32 = vmul.f32 %v2186_v62, %v2165_v3 }
 0x7b3   : >> { %2195 = vperm.xlu0 %3884, %v3909_v10   ;;  %v2166_v10 = vld [vmem:[#allocation6 + $0x20] sm:$0xff] }
 0x816   : >> { %v2134_v1 = vpop.xlane.xlu1 %2133 }
 0x817   : >> { %v2150_v31 = vadd.f32 %v2134_v1, %v2126_v55 }
 0x819   : >> { %2156 = vst.msk [vmem:[#allocation5] sm:$0xff] %vm1509_vm4, %v2150_v31 }
 0x81a   : >> { %v2137_v4 = vpop.xlane.xlu0 %2136 }
 0x81b   : >> { %v2151_v33 = vadd.f32 %v2137_v4, %v2127_v38 }
 0x81d   : >> { %2157 = vst.msk [vmem:[#allocation5 + $0x8] sm:$0xff] %vm1509_vm4, %v2151_v33 }
 0x81e   : >> { %v2140_v35 = vpop.xlane.xlu1 %2139 }
 0x81f   : >> { %v2152_v37 = vadd.f32 %v2140_v35, %v2128_v34 }
 0x821   : >> { %2158 = vst.msk [vmem:[#allocation5 + $0x10] sm:$0xff] %vm1509_vm4, %v2152_v37 }
 0x822   : >> { %v2143_v44 = vpop.xlane.xlu1 %2142 }
 0x823   : >> { %v2153_v41 = vadd.f32 %v2143_v44, %v2129_v12 }
 0x825   : >> { %2159 = vst.msk [vmem:[#allocation5 + $0x18] sm:$0xff] %vm1509_vm4, %v2153_v41 }
 0x826   : >> { %v2146_v39 = vpop.xlane.xlu0 %2145 }
 0x827   : >> { %v2154_v47 = vadd.f32 %v2146_v39, %v2130_v13 }
 0x829   : >> { %2160 = vst.msk [vmem:[#allocation5 + $0x20] sm:$0xff] %vm1509_vm4, %v2154_v47 }
 0x82a   : >> { %v2149_v16 = vpop.xlane.xlu1 %2148 }
 0x82b   : >> { %v2155_v11 = vadd.f32 %v2149_v16, %v2131_v5 }
 0x82d   : >> { %2161 = vst.msk [vmem:[#allocation5 + $0x28] sm:$0xff] %vm1509_vm4, %v2155_v11 }
 0x82e   : >> { %v2191_v25 = vpop.permute.xlu1 %2190  ;;  %v2196_v31 = vpop.permute.xlu0 %2195 }
 0x82f   : >> { %v2202_v1 = vmul.f32 %v2191_v25, %v2166_v10  ;;  %v2203_v7 = vmul.f32 %v2196_v31, %v2167_v26 }
 0x84c   : >> { %v2273_v14 = vpop.f32.mrf.mxu0 }
 0x84d   : >> { %v2642_v19 = vadd.f32 %v2273_v14, %v2198_v49 }
 0x84e   : >> { %v3713_v51 = vpop.f32.mrf.mxu0 }
 0x84f   : >> { %2648 = vst.msk [vmem:[#allocation6] sm:$0xff] %vm1522_vm5, %v2642_v19 }
 0x850   : >> { %v2346_v54 = vpop.f32.mrf.mxu1 }
 0x851   : >> { %v2643_v56 = vadd.f32 %v2346_v54, %v2199_v52 }
 0x852   : >> { %v3718_v63 = vpop.f32.mrf.mxu1 }
 0x853   : >> { %2649 = vst.msk [vmem:[#allocation6 + $0x8] sm:$0xff] %vm1522_vm5, %v2643_v56 }
 0x854   : >> { %v2419_v8 = vpop.f32.mrf.mxu0 }
 0x855   : >> { %v2644_v9 = vadd.f32 %v2419_v8, %v2200_v2 }
 0x856   : >> { %v3723_v18 = vpop.f32.mrf.mxu0 }
 0x857   : >> { %2650 = vst.msk [vmem:[#allocation6 + $0x10] sm:$0xff] %vm1522_vm5, %v2644_v9 }
 0x858   : >> { %v2492_v48 = vpop.f32.mrf.mxu1 }
 0x859   : >> { %v2645_v20 = vadd.f32 %v2492_v48, %v2201_v32 }
 0x85a   : >> { %v3728_v55 = vpop.f32.mrf.mxu1 }
 0x85b   : >> { %2651 = vst.msk [vmem:[#allocation6 + $0x18] sm:$0xff] %vm1522_vm5, %v2645_v20 }
 0x85c   : >> { %v2565_v0 = vpop.f32.mrf.mxu0 }
 0x85d   : >> { %v2646_v38 = vadd.f32 %v2565_v0, %v2202_v1 }
 0x85e   : >> { %v3733_v4 = vpop.f32.mrf.mxu0 }
 0x85f   : >> { %2652 = vst.msk [vmem:[#allocation6 + $0x20] sm:$0xff] %vm1522_vm5, %v2646_v38  ;;  %1539 = sbr.rel (!%p1536_p2) target bundleno = 1449 (0x5a9), region = 142 }
 0x860   : >> { %v2638_v33 = vpop.f32.mrf.mxu1 }
 0x861   : >> { %v2647_v62 = vadd.f32 %v2638_v33, %v2203_v7 }
 0x862   : >> { %v3738_v34 = vpop.f32.mrf.mxu1 }
 0x863   : >> { %2653 = vst.msk [vmem:[#allocation6 + $0x28] sm:$0xff] %vm1522_vm5, %v2647_v62 }
 0x864 PF: > { %v2668_v35 = vld [vmem:[#allocation5 + $0x10] sm:$0xff]  ;;  %v2666_v36 = vld [vmem:[#allocation5] sm:$0xff]  ;;  %3739 = vmatprep.subr.mxu0 %v4046_v6  ;;  %3741 = vmatprep.mubr.msk.f32.mxu0 %vm4048_vm6, %v4046_v6  ;;  %v4059_v37 = vmov 0   ;;  %v2669_v12 = vld [vmem:[#allocation5 + $0x18] sm:$0xff]  ;;  %vm3338_vm9 = vcmask 523264   ;;  %s3594_s23 = sshll.u32 %s4014_s29, 1 }
 0x865   : > { %3911 = vset.pattern.permute.xlu1 %v4059_v37  ;;  %3910 = vset.pattern.permute.xlu0 %v4059_v37  ;;  %v2667_v44 = vld [vmem:[#allocation5 + $0x8] sm:$0xff]  ;;  %v2670_v57 = vld [vmem:[#allocation5 + $0x20] sm:$0xff]  ;;  %v2714_v61 = vld [vmem:[%s4943_s5] sm:$0xff]  ;;  %s3426_s24 = sadd.s32 %s4010_s28, %s3594_s23  ;;  %s3430_s14 = sshll.u32 %s447_s27, 4  ;;  %s3431_s14 = int_to_ptr.vmem [resolvable:$true] %s3430_s14 }
 0x866   : > { %2684 = vperm.xlu1 %3911, %v2668_v35   ;;  %2674 = vperm.xlu0 %3910, %v2666_v36   ;;  %v2671_v40 = vld [vmem:[#allocation5 + $0x28] sm:$0xff]  ;;  %v2660_v28 = vld [vmem:[#allocation6] sm:$0xff]  ;;  %v2715_v42 = vld [vmem:[%s4943_s5 + $0x8] sm:$0xff]  ;;  %s3595_s30 = sshll.u32 %s3426_s24, 7  ;;  %s4972_s28 = sand.u32 1, %s4002_s26  }
 0x867   : > { %3342 = vmatprep.subr.mxu1 %v4046_v6  ;;  %3740 = vmatpush3.msra.mxu0 %v2714_v61  ;;  %v2661_v45 = vld [vmem:[#allocation6 + $0x8] sm:$0xff]  ;;  %v2662_v13 = vld [vmem:[#allocation6 + $0x10] sm:$0xff]  ;;  %v2717_v5 = vld [vmem:[%s4943_s5 + $0x18] sm:$0xff]  ;;  %s3428_s19 = scalar_lea.hbm %s4951_s13, %s3595_s30  ;;  %s3415_s29 = scalar_lea.sflag [#allocation8], %s4972_s28 }
 0x868   : > { %3744 = vmatprep.subr.mxu0 %v4046_v6  ;;  %v2716_v60 = vld [vmem:[%s4943_s5 + $0x10] sm:$0xff]  ;;  %v2663_v11 = vld [vmem:[#allocation6 + $0x18] sm:$0xff]  ;;  %v2718_v49 = vld [vmem:[%s4943_s5 + $0x20] sm:$0xff]  ;;  %s3926_s22 = scalar_lea.vmem %s3431_s14, 128  ;;  %s4060_s23 = smov [#allocation7]  }
 0x869   : > { %v2664_v14 = vld [vmem:[#allocation6 + $0x20] sm:$0xff]  ;;  %v2719_v51 = vld [vmem:[%s4943_s5 + $0x28] sm:$0xff]  ;;  %p3927_p4 = scmp.ne.s32.totalorder %s3431_s14, %s3926_s22  ;;  %s3930_s24 = sshll.u32 %s4060_s23, 4  ;;  %s3931_s24 = int_to_ptr.vmem [resolvable:$false] %s3930_s24 }
 0x86a   : > { %2689 = vperm.xlu1 %3911, %v2669_v12   ;;  %2679 = vperm.xlu0 %3910, %v2667_v44   ;;  %v2665_v53 = vld [vmem:[#allocation6 + $0x28] sm:$0xff]  ;;  %v3587_v62 = vld [vmem:[%s4944_s6] ss:$0 sm:$0xff]  ;;  %s3932_s16 = scalar_lea.vmem %s3931_s24, 256  ;;  %p3933_p7 = scmp.lt.s32.totalorder %s3431_s14, %s3931_s24 }
 0x86b   : > { %p3928_p5 = pnand %p3927_p4, %p4182_p3  ;;  %p3934_p9 = scmp.lt.s32.totalorder %s3932_s16, %s3926_s22 }
 0x86d   : > { %p3929_p6 = pneg %p3928_p5  ;;  %p3935_p10 = por %p3934_p9, %p3933_p7 }
 0x86e   : > { %2699 = vperm.xlu1 %3911, %v2671_v40   ;;  %2694 = vperm.xlu0 %3910, %v2670_v57  }
 0x86f   : > { %p3936_p11 = pnand %p3935_p10, %p3929_p6 }
 0x8e1   : > { %v2675_v21 = vpop.permute.xlu0 %2674  ;;  %v2685_v22 = vpop.permute.xlu1 %2684 }
 0x8e2   : > { %3912 = vrcp.f32 %v2675_v21 }
 0x8e3   : > { %3914 = vrcp.f32 %v2685_v22  ;;  %v3217_v22 = vld [vmem:[%s4947_s9 + $0x50] sm:$0xff] }
 0x8e5   : > { %v2680_v23 = vpop.permute.xlu0 %2679  ;;  %v2690_v24 = vpop.permute.xlu1 %2689 }
 0x8e6   : > { %3916 = vrcp.f32 %v2680_v23  ;;  %v3216_v23 = vld [vmem:[%s4947_s9 + $0x48] sm:$0xff] }
 0x8e7   : > { %3918 = vrcp.f32 %v2690_v24  ;;  %v3215_v24 = vld [vmem:[%s4947_s9 + $0x40] sm:$0xff] }
 0x8e9   : > { %v2695_v27 = vpop.permute.xlu0 %2694  ;;  %v2700_v43 = vpop.permute.xlu1 %2699 }
 0x8ea   : > { %3920 = vrcp.f32 %v2695_v27  ;;  %v3214_v27 = vld [vmem:[%s4947_s9 + $0x38] sm:$0xff] }
 0x8eb   : > { %3922 = vrcp.f32 %v2700_v43  ;;  %v3209_v43 = vld [vmem:[%s4947_s9 + $0x10] sm:$0xff] }
 0x8ef   : > { %v3913_v29 = vpop.eup %3912 }
 0x8f0   : > { %v2703_v30 = vmul.f32 %v3913_v29, %v2660_v28  ;;  %v3915_v46 = vpop.eup %3914  ;;  %v3213_v28 = vld [vmem:[%s4947_s9 + $0x30] sm:$0xff]  ;;  %v3212_v29 = vld [vmem:[%s4947_s9 + $0x28] sm:$0xff] }
 0x8f1   : > { %v2707_v47 = vmul.f32 %v3915_v46, %v2662_v13  ;;  %v3207_v46 = vld [vmem:[%s4947_s9] sm:$0xff]  ;;  %v3321_v13 = vld [vmem:[%s4949_s11 + $0x70] sm:$0xff] }
 0x8f2   : > { %3742 = vmatmul.mubr.msk.f32.vlgmr.msra.gmra.mxu0 %vm1522_vm5, %v2703_v30  ;;  %v3211_v30 = vld [vmem:[%s4947_s9 + $0x20] sm:$0xff] }
 0x8f3   : > { %v3917_v41 = vpop.eup %3916  ;;  %3745 = vmatpush3.msra.mxu0 %v2715_v42  ;;  %3746 = vmatprep.mubr.msk.f32.mxu0 %vm4048_vm6, %v4046_v6  ;;  %v3210_v42 = vld [vmem:[%s4947_s9 + $0x18] sm:$0xff] }
 0x8f4   : > { %3749 = vmatprep.subr.mxu0 %v4046_v6  ;;  %v2705_v39 = vmul.f32 %v3917_v41, %v2661_v45  ;;  %v3919_v16 = vpop.eup %3918  ;;  %v3208_v45 = vld [vmem:[%s4947_s9 + $0x8] sm:$0xff]  ;;  %v3322_v41 = vld [vmem:[%s4949_s11 + $0x78] sm:$0xff] }
 0x8f5   : > { %v2709_v15 = vmul.f32 %v3919_v16, %v2663_v11  ;;  %3343 = vmatpush1.msra.mxu1 %v3322_v41  ;;  %v3316_v16 = vld [vmem:[%s4949_s11 + $0x48] sm:$0xff]  ;;  %v3315_v11 = vld [vmem:[%s4949_s11 + $0x40] sm:$0xff] }
 0x8f6   : > { %3747 = vmatmul.mubr.msk.f32.vlgmr.msra.gmra.mxu0 %vm1522_vm5, %v2705_v39  ;;  %3344 = vmatprep.subr.mxu1 %v4046_v6  ;;  %v3320_v39 = vld [vmem:[%s4949_s11 + $0x68] sm:$0xff] }
 0x8f7   : > { %3750 = vmatpush3.msra.mxu0 %v2716_v60  ;;  %3751 = vmatprep.mubr.msk.f32.mxu0 %vm4048_vm6, %v4046_v6  ;;  %v3921_v50 = vpop.eup %3920  ;;  %v3319_v60 = vld [vmem:[%s4949_s11 + $0x60] sm:$0xff] }
 0x8f8   : > { %3754 = vmatprep.subr.mxu0 %v4046_v6  ;;  %v2711_v19 = vmul.f32 %v3921_v50, %v2664_v14  ;;  %v3923_v52 = vpop.eup %3922  ;;  %3345 = vmatpush1.msra.mxu1 %v3321_v13  ;;  %v3312_v50 = vld [vmem:[%s4949_s11 + $0x28] sm:$0xff]  ;;  %v3311_v14 = vld [vmem:[%s4949_s11 + $0x20] sm:$0xff] }
 0x8f9   : > { %v2713_v54 = vmul.f32 %v3923_v52, %v2665_v53  ;;  %3346 = vmatprep.subr.mxu1 %v4046_v6  ;;  %v3308_v52 = vld [vmem:[%s4949_s11 + $0x8] sm:$0xff]  ;;  %v3307_v53 = vld [vmem:[%s4949_s11] sm:$0xff] }
 0x8fa   : > { %3752 = vmatmul.mubr.msk.f32.vlgmr.msra.gmra.mxu0 %vm1522_vm5, %v2707_v47  ;;  %3347 = vmatpush1.msra.mxu1 %v3320_v39  ;;  %v3318_v47 = vld [vmem:[%s4949_s11 + $0x58] sm:$0xff] }
 0x8fb   : > { %3755 = vmatpush3.msra.mxu0 %v2717_v5  ;;  %3756 = vmatprep.mubr.msk.f32.mxu0 %vm4048_vm6, %v4046_v6  ;;  %v3317_v5 = vld [vmem:[%s4949_s11 + $0x50] sm:$0xff] }
 0x8fc   : > { %3759 = vmatprep.subr.mxu0 %v4046_v6  ;;  %3348 = vmatprep.subr.mxu1 %v4046_v6 }
 0x8fd   : > { %3349 = vmatpush1.msra.mxu1 %v3319_v60 }
 0x8fe   : > { %3757 = vmatmul.mubr.msk.f32.vlgmr.msra.gmra.mxu0 %vm1522_vm5, %v2709_v15  ;;  %3350 = vmatprep.subr.mxu1 %v4046_v6  ;;  %v3314_v15 = vld [vmem:[%s4949_s11 + $0x38] sm:$0xff] }
 0x8ff   : > { %3760 = vmatpush3.msra.mxu0 %v2718_v49  ;;  %3761 = vmatprep.mubr.msk.f32.mxu0 %vm4048_vm6, %v4046_v6  ;;  %v3313_v49 = vld [vmem:[%s4949_s11 + $0x30] sm:$0xff] }
 0x900   : > { %3764 = vmatprep.subr.mxu0 %v4046_v6  ;;  %3351 = vmatpush1.msra.mxu1 %v3318_v47 }
 0x901   : > { %3352 = vmatprep.subr.mxu1 %v4046_v6 }
 0x902   : > { %3762 = vmatmul.mubr.msk.f32.vlgmr.msra.gmra.mxu0 %vm1522_vm5, %v2711_v19  ;;  %3353 = vmatpush1.msra.mxu1 %v3317_v5  ;;  %v3310_v19 = vld [vmem:[%s4949_s11 + $0x18] sm:$0xff] }
 0x903   : > { %3765 = vmatpush3.msra.mxu0 %v2719_v51  ;;  %3766 = vmatprep.mubr.msk.f32.mxu0 %vm4048_vm6, %v4046_v6  ;;  %v3309_v51 = vld [vmem:[%s4949_s11 + $0x10] sm:$0xff] }
 0x904   : > { %3354 = vmatprep.subr.mxu1 %v4046_v6 }
 0x905   : > { %3355 = vmatpush1.msra.mxu1 %v3316_v16 }
 0x906   : > { %3767 = vmatmul.mubr.msk.f32.vlgmr.msra.gmra.mxu0 %vm1522_vm5, %v2713_v54  ;;  %3356 = vmatprep.subr.mxu1 %v4046_v6  ;;  %v3330_v54 = vld [vmem:[%s4949_s11 + $0xb8] sm:$0xff] }
 0x907   : > { %3298 = vmatprep.mubr.f32.mxu0 %v4046_v6  ;;  %3357 = vmatpush1.msra.mxu1 %v3315_v11 }
 0x908   : > { %3358 = vmatprep.subr.mxu1 %v4046_v6 }
 0x909   : > { %3359 = vmatpush1.msra.mxu1 %v3314_v15 }
 0x90a   : > { %3360 = vmatprep.subr.mxu1 %v4046_v6 }
 0x90b   : > { %3361 = vmatpush1.msra.mxu1 %v3313_v49 }
 0x90c   : > { %3362 = vmatprep.subr.mxu1 %v4046_v6 }
 0x90d   : > { %3363 = vmatpush1.msra.mxu1 %v3312_v50 }
 0x90e   : > { %3364 = vmatprep.subr.mxu1 %v4046_v6 }
 0x90f   : > { %3365 = vmatpush1.msra.mxu1 %v3311_v14 }
 0x910   : > { %3366 = vmatprep.subr.mxu1 %v4046_v6 }
 0x911   : > { %3367 = vmatpush1.msra.mxu1 %v3310_v19 }
 0x912   : > { %3368 = vmatprep.subr.mxu1 %v4046_v6 }
 0x913   : > { %3369 = vmatpush1.msra.mxu1 %v3309_v51 }
 0x914   : > { %3370 = vmatprep.subr.mxu1 %v4046_v6 }
 0x915   : > { %3371 = vmatpush1.msra.mxu1 %v3308_v52 }
 0x916   : > { %3372 = vmatprep.subr.mxu1 %v4046_v6 }
 0x917   : > { %3373 = vmatpush1.msra.mxu1 %v3307_v53 }
 0x918   : > { %3390 = vmatprep.subr.mxu1 %v4046_v6 }
 0x919   : > { %3391 = vmatpush2.msra.mxu1 %v3330_v54 }
 0x91a   : > { %3392 = vmatprep.subr.mxu1 %v4046_v6 }
 0x9b2   : > { %v2789_v56 = vpop.f32.mrf.mxu0 }
 0x9b3   : > { %v3158_v10 = vsel %vm1132_vm3, %v2789_v56, 0.0  ;;  %v3329_v56 = vld [vmem:[%s4949_s11 + $0xb0] sm:$0xff] }
 0x9b4   : > { %v3743_v63 = vpop.f32.mrf.mxu0  ;;  %3393 = vmatpush2.msra.mxu1 %v3329_v56 }
 0x9b5   : > { %v3328_v63 = vld [vmem:[%s4949_s11 + $0xa8] sm:$0xff]  ;;  %3394 = vmatprep.subr.mxu1 %v4046_v6 }
 0x9b6   : > { %v2862_v2 = vpop.f32.mrf.mxu0  ;;  %3395 = vmatpush2.msra.mxu1 %v3328_v63 }
 0x9b7   : > { %v3159_v18 = vsel %vm1132_vm3, %v2862_v2, 0.0  ;;  %v3327_v2 = vld [vmem:[%s4949_s11 + $0xa0] sm:$0xff]  ;;  %3396 = vmatprep.subr.mxu1 %v4046_v6 }
 0x9b8   : > { %v3748_v3 = vpop.f32.mrf.mxu0  ;;  %v3160_v48 = vadd.f32 %v3159_v18, %v3158_v10  ;;  %3397 = vmatpush2.msra.mxu1 %v3327_v2 }
 0x9b9   : > { %3398 = vmatprep.subr.mxu1 %v4046_v6 }
 0x9ba   : > { %v2935_v8 = vpop.f32.mrf.mxu0 }
 0x9bb   : > { %v3161_v25 = vsel %vm1132_vm3, %v2935_v8, 0.0 }
 0x9bc   : > { %v3753_v9 = vpop.f32.mrf.mxu0  ;;  %v3162_v1 = vadd.f32 %v3161_v25, %v3160_v48  ;;  %v3589_v25 = vld [vmem:[%s4946_s8] ss:$0 sm:$0xff] }
 0x9be   : > { %v3008_v32 = vpop.f32.mrf.mxu0 }
 0x9bf   : > { %v3163_v55 = vsel %vm1132_vm3, %v3008_v32, 0.0  ;;  %v3588_v32 = vld [vmem:[%s4945_s7] ss:$0 sm:$0xff] }
 0x9c0   : > { %v3758_v20 = vpop.f32.mrf.mxu0  ;;  %v3164_v0 = vadd.f32 %v3163_v55, %v3162_v1  ;;  %v3326_v55 = vld [vmem:[%s4949_s11 + $0x98] sm:$0xff]  ;;  %v3325_v1 = vld [vmem:[%s4949_s11 + $0x90] sm:$0xff] }
 0x9c1   : > { %3399 = vmatpush2.msra.mxu1 %v3326_v55 }
 0x9c2   : > { %v3081_v26 = vpop.f32.mrf.mxu0  ;;  %3400 = vmatprep.subr.mxu1 %v4046_v6 }
 0x9c3   : > { %v3165_v31 = vsel %vm1132_vm3, %v3081_v26, 0.0  ;;  %3401 = vmatpush2.msra.mxu1 %v3325_v1  ;;  %v3324_v26 = vld [vmem:[%s4949_s11 + $0x88] sm:$0xff] }
 0x9c4   : > { %v3763_v38 = vpop.f32.mrf.mxu0  ;;  %v3166_v4 = vadd.f32 %v3165_v31, %v3164_v0  ;;  %3402 = vmatprep.subr.mxu1 %v4046_v6  ;;  %v3323_v31 = vld [vmem:[%s4949_s11 + $0x80] sm:$0xff] }
 0x9c5   : > { %3403 = vmatpush2.msra.mxu1 %v3324_v26  ;;  %v3219_v0 = vld [vmem:[%s4948_s10] sm:$0x3]  ;;  %v3227_v38 = vsub.s32 1, %v4362_v59 }
 0x9c6   : > { %v3154_v7 = vpop.f32.mrf.mxu0  ;;  %3404 = vmatprep.subr.mxu1 %v4046_v6  ;;  %v3591_v59 = vld [vmem:[%s4950_s12] ss:$0 sm:$0xff] }
 0x9c7   : > { %v3167_v33 = vsel %vm1132_vm3, %v3154_v7, 0.0  ;;  %3405 = vmatpush2.msra.mxu1 %v3323_v31  ;;  %v3228_v7 = vrot.slane %v3219_v0, %v3227_v38 }
 0x9c8   : > { %v3168_v34 = vadd.f32 %v3167_v33, %v3166_v4  ;;  %v3768_v35 = vpop.f32.mrf.mxu0  ;;  %v3224_v4 = vrot.slane %v3219_v0, %v4428_v17 }
 0x9ca   : > { %v3176_v36 = vadd.f32 %v3587_v62, %v3168_v34 }
 0x9cc   : > { %v4728_v37 = vadd.f32 %v3176_v36, %v4359_v58  ;;  %v3218_v58 = vld [vmem:[%s4947_s9 + $0x58] sm:$0xff] }
 0x9cd   : > { %3254 = vmatprep.subr.mxu0 %v3218_v58 }
 0x9ce   : > { %v3180_v12 = vsel %vm1132_vm3, %v4728_v37, 0.0  ;;  %3255 = vmatpush1.msra.mxu0 %v3217_v22 }
 0x9cf   : > { %3181 = vadd.xlane.f32.xlu0 %v3180_v12  ;;  %3256 = vmatprep.subr.mxu0 %v3216_v23 }
 0x9d0   : > { %3257 = vmatpush1.msra.mxu0 %v3215_v24 }
 0x9d1   : > { %3258 = vmatprep.subr.mxu0 %v3214_v27 }
 0x9d2   : > { %3259 = vmatpush1.msra.mxu0 %v3213_v28 }
 0x9d3   : > { %3260 = vmatprep.subr.mxu0 %v3212_v29 }
 0x9d4   : > { %3261 = vmatpush1.msra.mxu0 %v3211_v30 }
 0x9d5   : > { %3262 = vmatprep.subr.mxu0 %v3210_v42 }
 0x9d6   : > { %3263 = vmatpush1.msra.mxu0 %v3209_v43 }
 0x9d7   : > { %3264 = vmatprep.subr.mxu0 %v3208_v45 }
 0x9d8   : > { %3265 = vmatpush1.msra.mxu0 %v3207_v46 }
 0xa58   : > { %v3182_v44 = vpop.xlane.xlu0 %3181 }
 0xa59   : > { %v3183_v40 = vmul.f32 0.020833334, %v3182_v44 }
 0xa5b   : > { %v4733_v57 = vsub.f32 %v4728_v37, %v3183_v40 }
 0xa5d   : > { %v3185_v61 = vmul.f32 %v4733_v57, %v4733_v57 }
 0xa5f   : > { %v3186_v21 = vsel %vm1132_vm3, %v3185_v61, 0.0 }
 0xa60   : > { %3187 = vadd.xlane.f32.xlu1 %v3186_v21 }
 0xae9   : > { %v3188_v3 = vpop.xlane.xlu1 %3187 }
 0xaea   : > { %v3189_v8 = vmul.f32 0.020833334, %v3188_v3 }
 0xaec   : > { %v3190_v9 = vadd.f32 1e-05, %v3189_v8 }
 0xaee   : > { %3924 = vrsqrt.f32 %v3190_v9 }
 0xafb   : > { %v3925_v18 = vpop.eup %3924 }
 0xafc   : > { %v3192_v10 = vmul.f32 %v3925_v18, %v4733_v57 }
 0xafe   : > { %v3199_v48 = vmul.f32 %v3588_v32, %v3192_v10 }
 0xb00   : > { %v3206_v20 = vadd.f32 %v3589_v25, %v3199_v48 }
 0xb02   : > { %3590 = vmatmul.mubr.msk.f32.vlgmr.msra.gmra.mxu0 %vm1132_vm3, %v3206_v20 }
 0xbc2   : > { %v3300_v33 = vpop.f32.mrf.mxu0 }
 0xbc3   : > { %v3301_v62 = vadd.f32 %v3300_v33, %v3224_v4 }
 0xbc4   : > { %v3302_v34 = vpop.f32.mrf.mxu0 }
 0xbc5   : > { %v3303_v35 = vadd.f32 %v3302_v34, %v3228_v7  ;;  %v3305_v6 = vmax.f32 %v3301_v62, 0.0 }
 0xbc7   : > { %v3306_v36 = vmax.f32 %v3303_v35, 0.0 }
 0xbc9   : > { %3592 = vmatprep.mubr.msk.f32.mxu1 %vm3338_vm9, %v3306_v36 }
 0xbca   : > { %3407 = vmatmul.mubr.f32.vlgmr.msra.gmra.mxu1 %v3305_v6 }
 0xc8a   : > { %v3408_v17 = vpop.f32.mrf.mxu1 }
 0xc8b   : > { %v3409_v12 = vadd.f32 %v3591_v59, %v3408_v17 }
 0xc8c   : > { %v3410_v44 = vpop.f32.mrf.mxu1 }
 0xc8d   : > { %v3412_v40 = vadd.f32 %v3409_v12, %v4728_v37 }
 0xc8f   : > { %3413 = vst.msk [vmem:[%s447_s27] sm:$0xff] %vm1132_vm3, %v3412_v40 }
 0xc90   : > { %3939 = shalt.err (!%p3936_p11)
}
 0xc91   : > { %s3940_s17 = scalar_lea.hbm %s3428_s19, 128  ;;  %s3944_s30 = scalar_lea.hbm %s4951_s13, 512 }
 0xc92   : > { %p3941_p12 = scmp.ne.s32.totalorder %s3428_s19, %s3940_s17  ;;  %p3945_p1 = scmp.lt.s32.totalorder %s3428_s19, %s4951_s13 }
 0xc93   : > { %p3946_p2 = scmp.lt.s32.totalorder %s3944_s30, %s3940_s17 }
 0xc94   : > { %p3942_p13 = pnand %p3941_p12, %p4182_p3 }
 0xc95   : > { %p3947_p4 = por %p3946_p2, %p3945_p1 }
 0xc96   : > { %p3943_p0 = pneg %p3942_p13 }
 0xc98   : > { %p3948_p5 = pnand %p3947_p4, %p3943_p0 }
 0xc9a   : > { %3951 = shalt.err (!%p3948_p5)
}
 0xc9b   : > { %3769 = dma.vmem_to_hbm [thread:$0]  (%p4182_p3), %s3431_s14, 128, %s3428_s19, %s3415_s29  }
 0xc9c PF: > { %s4973_s28 = sld [smem:[#allocation10_spill]]  ;;  %p3775_p6 = scmp.ge.s32.totalorder %s4026_s15, 2 }
 0xc9e   : > { %p3772_p7 = pnand %p3775_p6, %p4191_p8 }
 0xca0   : > { %p3773_p9 = pneg %p3772_p7 }
 0xca2   : > { %s3442_s23 = sand.u32 1, %s4973_s28  }
 0xca3   : > { %s3443_s24 = scalar_lea.sflag [#allocation8], %s3442_s23 }
 0xca4   : > { %3993 = dma.done.wait (%p3773_p9), %s3443_s24, 128  }
 0xca5   : > { %3995 = vsyncadd (%p3773_p9), %s3443_s24, 4294967168  ;;  %s26_s15 = sadd.s32 1, %s4026_s15   ;;  %s4975_s16 = sld [smem:[#allocation11_spill]] }
 0xca6   : > { %p23_p10 = scmp.ge.s32.totalorder %s26_s15, 6   ;;  %s4976_s27 = sld [smem:[#allocation17_spill]] }
 0xca7   : > { %s4977_s28 = sld [smem:[#allocation12_spill]]  ;;  %s4981_s25 = smov %s4002_s26 }
 0xca8   : > { %s4978_s29 = sld [smem:[#allocation13_spill]]  ;;  %25 = sbr.rel (!%p23_p10) target bundleno = 5 (0x5), region = 153 }
 0xca9   : > { %s4979_s30 = sld [smem:[#allocation14_spill]] }
 0xcaa   : > { %s4980_s14 = sld [smem:[#allocation15_spill]] }
 0xcab   : > { %s4982_s26 = smov %s4975_s16 }
 0xcad   :  { %3448 = vsyncpa [#allocation8], 1 }
 0xcae   :  { %3450 = vsyncpa [#allocation8 + $0x1], 1 }

</bundles_post_ra>
